<compile_context>
chip_gen: v5e
topology: v5e:2x2
jax: 0.10.0
libtpu: 0.0.40
codegen_flags: <defaults>
</compile_context>

<pallas_src>
import math
from functools import partial

import jax
import jax.numpy as jnp
import numpy as np
from jax.experimental import pallas as pl
from jax.experimental.pallas import tpu as pltpu


# ----------------------------------------------------------------------------
# Tile / VMEM helpers
# ----------------------------------------------------------------------------

def _pick_tile(n, target, quantum):
    """Largest tile <= target that divides n and is a multiple of `quantum`
    (falls back to n itself, which always satisfies the full-dim rule)."""
    if n <= target:
        return n
    t = (target // quantum) * quantum
    while t >= quantum:
        if n % t == 0:
            return t
        t -= quantum
    return n


def _pick_row_tile(r, target=512, quantum=16):
    """Row tile: large (raises arithmetic intensity vs streamed weights) but
    try to keep >= 2 row blocks so the 'parallel' axis can feed both v7x TCs."""
    tm = _pick_tile(r, target, quantum)
    if r // tm < 2:
        smaller = _pick_tile(r, max(quantum, r // 2), quantum)
        if smaller < tm and smaller >= quantum and r % smaller == 0:
            tm = smaller
    return tm


_VMEM_CACHE = [None]


def _vmem_limit_bytes():
    """Generation-aware scoped-VMEM limit: ~3/4 of physical, capped at 96 MB.
    -> ~48 MB on v7x (64 MiB VMEM), 96 MB on v5e/v6e (128 MiB VMEM)."""
    if _VMEM_CACHE[0] is None:
        cap = None
        try:
            info_fn = getattr(pltpu, "get_tpu_info", None)
            if info_fn is not None:
                cap = getattr(info_fn(), "vmem_capacity_bytes", None)
        except Exception:
            cap = None
        if cap:
            _VMEM_CACHE[0] = int(min(cap * 3 // 4, 96 * 1024 * 1024))
        else:
            _VMEM_CACHE[0] = 64 * 1024 * 1024
    return _VMEM_CACHE[0]


# ----------------------------------------------------------------------------
# Fused LayerNorm -> matmul (+ optional tanh-GELU) kernel
#   grid = (row_tiles, n_tiles, k_tiles); K is the reduction axis (last)
# ----------------------------------------------------------------------------

def _make_ln_matmul_kernel(tk, n_k, activation):
    def kernel(x_ref, g_ref, b_ref, w_ref, bias_ref, o_ref, xn_ref, acc_ref):
        k = pl.program_id(2)

        @pl.when(k == 0)
        def _():
            # LayerNorm in f32, recomputed per (row-tile, n-tile): cheap vs the
            # matmul and keeps correctness independent of megacore sharding.
            x = x_ref[...].astype(jnp.float32)
            mu = jnp.mean(x, axis=-1, keepdims=True)
            var = jnp.mean(jnp.square(x - mu), axis=-1, keepdims=True)
            xhat = (x - mu) * jax.lax.rsqrt(var + 1e-5)
            xn = (xhat * g_ref[...] + b_ref[...]).astype(xn_ref.dtype)
            for kk in range(n_k):               # static, aligned lane slices
                xn_ref[kk] = xn[:, kk * tk:(kk + 1) * tk]
            acc_ref[...] = jnp.zeros_like(acc_ref)

        # hot loop: leading-axis indexed scratch read (pure address offset)
        acc_ref[...] += jnp.dot(xn_ref[k], w_ref[...],
                                preferred_element_type=jnp.float32)

        @pl.when(k == pl.num_programs(2) - 1)
        def _():
            h = acc_ref[...] + bias_ref[...]
            if activation == "gelu_tanh":
                c = math.sqrt(2.0 / math.pi)
                h = 0.5 * h * (1.0 + jnp.tanh(c * (h + 0.044715 * h * h * h)))
            o_ref[...] = h.astype(o_ref.dtype)

    return kernel


def ln_matmul(x2d, gamma, beta, w, bias, activation=None,
              out_dtype=jnp.bfloat16):
    """out = act( LN(x2d; gamma,beta) @ w + bias )."""
    r, c = x2d.shape
    k_dim, n = w.shape
    assert k_dim == c
    w = w.astype(jnp.bfloat16)            # no-op when params were prepared
    tm = _pick_row_tile(r)
    tk = _pick_tile(c, 512, 128)
    tn = _pick_tile(n, 512, 128)
    n_k = c // tk
    kernel = _make_ln_matmul_kernel(tk=tk, n_k=n_k, activation=activation)
    return pl.pallas_call(
        kernel,
        out_shape=jax.ShapeDtypeStruct((r, n), out_dtype),
        grid=(r // tm, n // tn, n_k),
        in_specs=[
            pl.BlockSpec((tm, c), lambda i, j, k: (i, 0)),   # x rows (full C)
            pl.BlockSpec((1, c), lambda i, j, k: (0, 0)),    # gamma
            pl.BlockSpec((1, c), lambda i, j, k: (0, 0)),    # beta
            pl.BlockSpec((tk, tn), lambda i, j, k: (k, j)),  # weight tile
            pl.BlockSpec((1, tn), lambda i, j, k: (0, j)),   # bias tile
        ],
        out_specs=pl.BlockSpec((tm, tn), lambda i, j, k: (i, j)),
        scratch_shapes=[
            pltpu.VMEM((n_k, tm, tk), jnp.bfloat16),         # LN rows, K-split
            pltpu.VMEM((tm, tn), jnp.float32),               # f32 accumulator
        ],
        compiler_params=pltpu.CompilerParams(
            dimension_semantics=("parallel", "parallel", "arbitrary"),
            vmem_limit_bytes=_vmem_limit_bytes()),
    )(x2d, gamma[None, :], beta[None, :], w, bias[None, :])


# ----------------------------------------------------------------------------
# Fused matmul + bias + residual kernel (N- and K-tiled, f32 accumulator)
# ----------------------------------------------------------------------------

def _matmul_residual_kernel(x_ref, w_ref, bias_ref, res_ref, o_ref, acc_ref):
    k = pl.program_id(2)

    @pl.when(k == 0)
    def _():
        acc_ref[...] = jnp.zeros_like(acc_ref)

    acc_ref[...] += jnp.dot(x_ref[...].astype(jnp.bfloat16), w_ref[...],
                            preferred_element_type=jnp.float32)

    @pl.when(k == pl.num_programs(2) - 1)
    def _():
        o_ref[...] = (acc_ref[...] + bias_ref[...]
                      + res_ref[...].astype(jnp.float32)).astype(o_ref.dtype)


def matmul_residual(x2d, w, bias, res2d):
    """out = x2d @ w + bias + res2d  (output in res2d dtype)."""
    r, k_dim = x2d.shape
    _, n = w.shape
    w = w.astype(jnp.bfloat16)
    tm = _pick_row_tile(r)
    tk = _pick_tile(k_dim, 512, 128)
    tn = _pick_tile(n, 512, 128)
    return pl.pallas_call(
        _matmul_residual_kernel,
        out_shape=jax.ShapeDtypeStruct((r, n), res2d.dtype),
        grid=(r // tm, n // tn, k_dim // tk),
        in_specs=[
            pl.BlockSpec((tm, tk), lambda i, j, k: (i, k)),  # activation tile
            pl.BlockSpec((tk, tn), lambda i, j, k: (k, j)),  # weight tile
            pl.BlockSpec((1, tn), lambda i, j, k: (0, j)),   # bias tile
            pl.BlockSpec((tm, tn), lambda i, j, k: (i, j)),  # residual tile
        ],
        out_specs=pl.BlockSpec((tm, tn), lambda i, j, k: (i, j)),
        scratch_shapes=[pltpu.VMEM((tm, tn), jnp.float32)],
        compiler_params=pltpu.CompilerParams(
            dimension_semantics=("parallel", "parallel", "arbitrary"),
            vmem_limit_bytes=_vmem_limit_bytes()),
    )(x2d, w, bias[None, :], res2d)


# ----------------------------------------------------------------------------
# Causal multi-head attention: grid over (batch, head, q-tiles)
# ----------------------------------------------------------------------------

def _attention_kernel(q_ref, k_ref, v_ref, o_ref, raw_ref):
    # q_ref: (1,1,tq,hd); k_ref/v_ref: (1,1,T,hd)
    tq, hd = q_ref.shape[2], q_ref.shape[3]
    qi = pl.program_id(2)
    scale = 1.0 / math.sqrt(hd)

    # fold the softmax scale into q (cheaper than scaling the tq x T scores)
    qs = (q_ref[0, 0].astype(jnp.float32) * scale).astype(jnp.bfloat16)
    kb = k_ref[0, 0].astype(jnp.bfloat16)
    vb = v_ref[0, 0].astype(jnp.bfloat16)

    # (tq, T) scores; contraction on hd, accumulate in f32
    scores = jnp.einsum("qd,kd->qk", qs, kb,
                        preferred_element_type=jnp.float32)

    t_kv = scores.shape[1]
    row = qi * tq + jax.lax.broadcasted_iota(jnp.int32, (tq, t_kv), 0)
    col = jax.lax.broadcasted_iota(jnp.int32, (tq, t_kv), 1)
    scores = jnp.where(col <= row, scores, -jnp.inf)
    raw_ref[0, 0] = scores.astype(raw_ref.dtype)

    m = jnp.max(scores, axis=-1, keepdims=True)
    p = jnp.exp(scores - m)
    denom = jnp.sum(p, axis=-1, keepdims=True)
    att = (p * pl.reciprocal(denom, approx=True)).astype(jnp.bfloat16)

    out = jnp.dot(att, vb, preferred_element_type=jnp.float32)
    o_ref[0, 0] = out.astype(o_ref.dtype)


def causal_attention(q, k, v, raw_dtype=jnp.bfloat16):
    # q, k, v: (B, H, T, hd)
    b, h, t, hd = q.shape
    tq = _pick_tile(t, 256, 8)
    q_spec = pl.BlockSpec((1, 1, tq, hd), lambda bi, hi, qi: (bi, hi, qi, 0))
    kv_spec = pl.BlockSpec((1, 1, t, hd), lambda bi, hi, qi: (bi, hi, 0, 0))
    raw_spec = pl.BlockSpec((1, 1, tq, t), lambda bi, hi, qi: (bi, hi, qi, 0))
    return pl.pallas_call(
        _attention_kernel,
        out_shape=(jax.ShapeDtypeStruct((b, h, t, hd), q.dtype),
                   jax.ShapeDtypeStruct((b, h, t, t), raw_dtype)),
        grid=(b, h, t // tq),
        in_specs=[q_spec, kv_spec, kv_spec],
        out_specs=(q_spec, raw_spec),
        compiler_params=pltpu.CompilerParams(
            dimension_semantics=("parallel", "parallel", "parallel"),
            vmem_limit_bytes=_vmem_limit_bytes()),
    )(q, k, v)


# ----------------------------------------------------------------------------
# Block forward
# ----------------------------------------------------------------------------

def prepare_params(params):
    """Hoist the f32 -> bf16 weight casts out of the forward pass (run once)."""
    p = dict(params)
    for name in ("w_attn", "w_attn_proj", "w_fc", "w_proj"):
        p[name] = params[name].astype(jnp.bfloat16)
    return p


@partial(jax.jit, static_argnums=(2,))
def block_forward(x, params, n_head):
    """x: (B, T, C) float32. Returns (y, M, raw_att) like Block.forward."""
    B, T, C = x.shape
    hd = C // n_head
    x_flat = x.reshape(B * T, C)

    # --- attention branch: fused LN1 -> QKV matmul (bf16 activations out) ---
    qkv = ln_matmul(x_flat, params["ln1_g"], params["ln1_b"],
                    params["w_attn"], params["b_attn"])            # (B*T, 3C)

    # one fused reshape+transpose pass to head-major (q, k, v are views)
    qkv5 = qkv.reshape(B, T, 3, n_head, hd).transpose(2, 0, 3, 1, 4)
    y, raw_att = causal_attention(qkv5[0], qkv5[1], qkv5[2])

    # back to token-major (one pass), then fused proj + bias + residual
    y2d = y.transpose(0, 2, 1, 3).reshape(B * T, C)
    x2 = matmul_residual(y2d, params["w_attn_proj"], params["b_attn_proj"],
                         x_flat)

    # --- MLP branch: fused LN2 -> FC -> tanh-GELU, then proj + residual ---
    hidden = ln_matmul(x2, params["ln2_g"], params["ln2_b"],
                       params["w_fc"], params["b_fc"],
                       activation="gelu_tanh")                     # (B*T, 4C)
    out = matmul_residual(hidden, params["w_proj"], params["b_proj"], x2)

    M = None  # TODO(synk): unknown attention_kind; no compression matrix M here.
    return out.reshape(B, T, C), M, raw_att


# ----------------------------------------------------------------------------
# Pure-JAX reference (for a sanity check)
# ----------------------------------------------------------------------------

def _ref_block(x, params, n_head):
    B, T, C = x.shape
    hd = C // n_head

    def ln(v, g, b):
        mu = v.mean(-1, keepdims=True)
        var = ((v - mu) ** 2).mean(-1, keepdims=True)
        return (v - mu) / jnp.sqrt(var + 1e-5) * g + b

    h1 = ln(x, params["ln1_g"], params["ln1_b"])
    qkv = h1 @ params["w_attn"] + params["b_attn"]
    q, k, v = jnp.split(qkv, 3, axis=-1)
    q = q.reshape(B, T, n_head, hd).transpose(0, 2, 1, 3)
    k = k.reshape(B, T, n_head, hd).transpose(0, 2, 1, 3)
    v = v.reshape(B, T, n_head, hd).transpose(0, 2, 1, 3)
    scores = jnp.einsum("bhqd,bhkd->bhqk", q, k) / math.sqrt(hd)
    mask = jnp.tril(jnp.ones((T, T), bool))
    scores = jnp.where(mask, scores, -jnp.inf)
    att = jax.nn.softmax(scores, axis=-1)
    y = jnp.einsum("bhqk,bhkd->bhqd", att, v).transpose(0, 2, 1, 3).reshape(B, T, C)
    x2 = x + (y @ params["w_attn_proj"] + params["b_attn_proj"])
    h2 = ln(x2, params["ln2_g"], params["ln2_b"])
    hid = h2 @ params["w_fc"] + params["b_fc"]
    c = math.sqrt(2.0 / math.pi)
    hid = 0.5 * hid * (1.0 + jnp.tanh(c * (hid + 0.044715 * hid ** 3)))
    out = x2 + (hid @ params["w_proj"] + params["b_proj"])
    return out, scores


# ----------------------------------------------------------------------------
# Main
# ----------------------------------------------------------------------------

if __name__ == "__main__":
    B, T, C, n_head = 2, 8, 32, 4

    key = jax.random.PRNGKey(0)
    ks = jax.random.split(key, 10)

    def w(k, shape, scale=0.02):
        return (scale * jax.random.normal(k, shape)).astype(jnp.float32)

    params = {
        "ln1_g": jnp.ones((C,), jnp.float32),
        "ln1_b": jnp.zeros((C,), jnp.float32),
        "w_attn": w(ks[0], (C, 3 * C)),
        "b_attn": w(ks[1], (3 * C,)),
        "w_attn_proj": w(ks[2], (C, C)),
        "b_attn_proj": w(ks[3], (C,)),
        "ln2_g": jnp.ones((C,), jnp.float32),
        "ln2_b": jnp.zeros((C,), jnp.float32),
        "w_fc": w(ks[4], (C, 4 * C)),
        "b_fc": w(ks[5], (4 * C,)),
        "w_proj": w(ks[6], (4 * C, C)),
        "b_proj": w(ks[7], (C,)),
    }

    x = jax.random.normal(ks[8], (B, T, C), jnp.float32)

    bf16_params = prepare_params(params)   # weight casts hoisted out of forward
    y, M, raw_att = block_forward(x, bf16_params, n_head)
    y = jax.block_until_ready(y)
    raw_att = jax.block_until_ready(raw_att)

    assert y.shape == x.shape
    assert raw_att.shape == (B, n_head, T, T)

    # sanity check vs pure-JAX f32 reference (tolerance loosened for bf16)
    y_ref, raw_ref = _ref_block(x, params, n_head)
    np.testing.assert_allclose(np.asarray(y), np.asarray(y_ref),
                               rtol=2e-2, atol=2e-2)
    np.testing.assert_allclose(np.asarray(raw_att.astype(jnp.float32)),
                               np.asarray(raw_ref), rtol=2e-2, atol=2e-2)

    print("KERNEL_OK")
</pallas_src>

<mosaic_0001>
module attributes {stable_mosaic.version = 11 : i64} {
  func.func @kernel(%arg0: i32, %arg1: i32, %arg2: i32, %arg3: memref<16x32xf32, #tpu.memory_space<vmem>>, %arg4: memref<1x32xf32, #tpu.memory_space<vmem>>, %arg5: memref<1x32xf32, #tpu.memory_space<vmem>>, %arg6: memref<32x96xbf16, #tpu.memory_space<vmem>>, %arg7: memref<1x96xf32, #tpu.memory_space<vmem>>, %arg8: memref<16x96xbf16, #tpu.memory_space<vmem>>, %arg9: memref<1x16x32xbf16, #tpu.memory_space<vmem>>, %arg10: memref<16x96xf32, #tpu.memory_space<vmem>>) attributes {dimension_semantics = [#tpu.dimension_semantics<parallel>, #tpu.dimension_semantics<parallel>, #tpu.dimension_semantics<arbitrary>], iteration_bounds = array<i64: 1, 1, 1>, scalar_prefetch = 0 : i64, scratch_operands = 2 : i64, tpu.core_type = #tpu.core_type<tc>, window_params = [{transform_indices = @transform_0, window_bounds = array<i64: 16, 32>}, {pipeline_mode = #tpu.pipeline_mode<synchronous>, transform_indices = @transform_1, window_bounds = array<i64: 1, 32>}, {pipeline_mode = #tpu.pipeline_mode<synchronous>, transform_indices = @transform_2, window_bounds = array<i64: 1, 32>}, {transform_indices = @transform_3, window_bounds = array<i64: 32, 96>}, {transform_indices = @transform_4, window_bounds = array<i64: 1, 96>}, {transform_indices = @transform_5, window_bounds = array<i64: 16, 96>}]} {
    %c0_i32 = arith.constant 0 : i32
    %0 = arith.cmpi eq, %arg2, %c0_i32 : i32
    %1 = arith.extui %0 : i1 to i32
    %c0_i32_0 = arith.constant 0 : i32
    %2 = arith.cmpi ne, %1, %c0_i32_0 : i32
    scf.if %2 {
      %c0_10 = arith.constant 0 : index
      %c0_11 = arith.constant 0 : index
      %14 = vector.load %arg3[%c0_10, %c0_11] : memref<16x32xf32, #tpu.memory_space<vmem>>, vector<16x32xf32>
      %cst_12 = arith.constant dense<0.000000e+00> : vector<16xf32>
      %15 = vector.multi_reduction <add>, %14, %cst_12 [1] : vector<16x32xf32> to vector<16xf32>
      %16 = vector.shape_cast %15 : vector<16xf32> to vector<16x1xf32>
      %cst_13 = arith.constant 3.200000e+01 : f32
      %17 = vector.broadcast %cst_13 : f32 to vector<16x1xf32>
      %18 = arith.divf %16, %17 : vector<16x1xf32>
      %19 = vector.broadcast %18 : vector<16x1xf32> to vector<16x32xf32>
      %20 = arith.subf %14, %19 : vector<16x32xf32>
      %21 = arith.mulf %20, %20 : vector<16x32xf32>
      %cst_14 = arith.constant dense<0.000000e+00> : vector<16xf32>
      %22 = vector.multi_reduction <add>, %21, %cst_14 [1] : vector<16x32xf32> to vector<16xf32>
      %23 = vector.shape_cast %22 : vector<16xf32> to vector<16x1xf32>
      %cst_15 = arith.constant 3.200000e+01 : f32
      %24 = vector.broadcast %cst_15 : f32 to vector<16x1xf32>
      %25 = arith.divf %23, %24 : vector<16x1xf32>
      %26 = vector.broadcast %18 : vector<16x1xf32> to vector<16x32xf32>
      %27 = arith.subf %14, %26 : vector<16x32xf32>
      %cst_16 = arith.constant 9.99999974E-6 : f32
      %28 = vector.broadcast %cst_16 : f32 to vector<16x1xf32>
      %29 = arith.addf %25, %28 : vector<16x1xf32>
      %30 = math.rsqrt %29 : vector<16x1xf32>
      %31 = vector.broadcast %30 : vector<16x1xf32> to vector<16x32xf32>
      %32 = arith.mulf %27, %31 : vector<16x32xf32>
      %c0_17 = arith.constant 0 : index
      %c0_18 = arith.constant 0 : index
      %33 = vector.load %arg4[%c0_17, %c0_18] : memref<1x32xf32, #tpu.memory_space<vmem>>, vector<1x32xf32>
      %34 = vector.broadcast %33 : vector<1x32xf32> to vector<16x32xf32>
      %35 = arith.mulf %32, %34 : vector<16x32xf32>
      %c0_19 = arith.constant 0 : index
      %c0_20 = arith.constant 0 : index
      %36 = vector.load %arg5[%c0_19, %c0_20] : memref<1x32xf32, #tpu.memory_space<vmem>>, vector<1x32xf32>
      %37 = vector.broadcast %36 : vector<1x32xf32> to vector<16x32xf32>
      %38 = arith.addf %35, %37 : vector<16x32xf32>
      %39 = arith.truncf %38 : vector<16x32xf32> to vector<16x32xbf16>
      %c0_21 = arith.constant 0 : index
      %c0_22 = arith.constant 0 : index
      %c0_23 = arith.constant 0 : index
      %40 = vector.load %arg9[%c0_21, %c0_22, %c0_23] : memref<1x16x32xbf16, #tpu.memory_space<vmem>>, vector<1x16x32xbf16>
      %41 = vector.shape_cast %40 : vector<1x16x32xbf16> to vector<16x32xbf16>
      %42 = vector.shape_cast %39 : vector<16x32xbf16> to vector<1x16x32xbf16>
      tpu.vector_store %arg9[%c0_21, %c0_22, %c0_23], %42 {strides = array<i32>} : memref<1x16x32xbf16, #tpu.memory_space<vmem>>, vector<1x16x32xbf16>,
      %cst_24 = arith.constant 0.000000e+00 : f32
      %43 = vector.broadcast %cst_24 : f32 to vector<16x96xf32>
      %c0_25 = arith.constant 0 : index
      %c0_26 = arith.constant 0 : index
      %44 = vector.load %arg10[%c0_25, %c0_26] : memref<16x96xf32, #tpu.memory_space<vmem>>, vector<16x96xf32>
      tpu.vector_store %arg10[%c0_25, %c0_26], %43 {strides = array<i32>} : memref<16x96xf32, #tpu.memory_space<vmem>>, vector<16x96xf32>,
    } else {
    }
    %c0 = arith.constant 0 : index
    %c0_1 = arith.constant 0 : index
    %3 = vector.load %arg10[%c0, %c0_1] : memref<16x96xf32, #tpu.memory_space<vmem>>, vector<16x96xf32>
    %4 = arith.index_cast %arg2 : i32 to index
    %c0_2 = arith.constant 0 : index
    %c0_3 = arith.constant 0 : index
    %5 = vector.load %arg9[%4, %c0_2, %c0_3] : memref<1x16x32xbf16, #tpu.memory_space<vmem>>, vector<1x16x32xbf16>
    %6 = vector.shape_cast %5 : vector<1x16x32xbf16> to vector<16x32xbf16>
    %c0_4 = arith.constant 0 : index
    %c0_5 = arith.constant 0 : index
    %7 = vector.load %arg6[%c0_4, %c0_5] : memref<32x96xbf16, #tpu.memory_space<vmem>>, vector<32x96xbf16>
    %cst = arith.constant dense<0.000000e+00> : vector<16x96xf32>
    %8 = tpu.matmul %6, %7, %cst {dimension_numbers = #tpu.dot_dimension_numbers<[1], [0], [0], [1], [0, 0, 1, 1], [], []>} : vector<16x32xbf16>, vector<32x96xbf16>, vector<16x96xf32> -> vector<16x96xf32>
    %9 = arith.addf %3, %8 : vector<16x96xf32>
    %c0_6 = arith.constant 0 : index
    %c0_7 = arith.constant 0 : index
    %10 = vector.load %arg10[%c0_6, %c0_7] : memref<16x96xf32, #tpu.memory_space<vmem>>, vector<16x96xf32>
    tpu.vector_store %arg10[%c0_6, %c0_7], %9 {strides = array<i32>} : memref<16x96xf32, #tpu.memory_space<vmem>>, vector<16x96xf32>,
    %c0_i32_8 = arith.constant 0 : i32
    %11 = arith.cmpi eq, %arg2, %c0_i32_8 : i32
    %12 = arith.extui %11 : i1 to i32
    %c0_i32_9 = arith.constant 0 : i32
    %13 = arith.cmpi ne, %12, %c0_i32_9 : i32
    scf.if %13 {
      %c0_10 = arith.constant 0 : index
      %c0_11 = arith.constant 0 : index
      %14 = vector.load %arg10[%c0_10, %c0_11] : memref<16x96xf32, #tpu.memory_space<vmem>>, vector<16x96xf32>
      %c0_12 = arith.constant 0 : index
      %c0_13 = arith.constant 0 : index
      %15 = vector.load %arg7[%c0_12, %c0_13] : memref<1x96xf32, #tpu.memory_space<vmem>>, vector<1x96xf32>
      %16 = vector.broadcast %15 : vector<1x96xf32> to vector<16x96xf32>
      %17 = arith.addf %14, %16 : vector<16x96xf32>
      %18 = arith.truncf %17 : vector<16x96xf32> to vector<16x96xbf16>
      %c0_14 = arith.constant 0 : index
      %c0_15 = arith.constant 0 : index
      %19 = vector.load %arg8[%c0_14, %c0_15] : memref<16x96xbf16, #tpu.memory_space<vmem>>, vector<16x96xbf16>
      tpu.vector_store %arg8[%c0_14, %c0_15], %18 {strides = array<i32>} : memref<16x96xbf16, #tpu.memory_space<vmem>>, vector<16x96xbf16>,
    } else {
    }
    return
  }
  func.func @transform_0(%arg0: i32, %arg1: i32, %arg2: i32) -> (i32, i32) {
    %c0_i32 = arith.constant 0 : i32
    %c0_i32_0 = arith.constant 0 : i32
    return %arg0, %c0_i32 : i32, i32
  }
  func.func @transform_1(%arg0: i32, %arg1: i32, %arg2: i32) -> (i32, i32) {
    %c0_i32 = arith.constant 0 : i32
    %c0_i32_0 = arith.constant 0 : i32
    %c0_i32_1 = arith.constant 0 : i32
    return %c0_i32, %c0_i32_0 : i32, i32
  }
  func.func @transform_2(%arg0: i32, %arg1: i32, %arg2: i32) -> (i32, i32) {
    %c0_i32 = arith.constant 0 : i32
    %c0_i32_0 = arith.constant 0 : i32
    %c0_i32_1 = arith.constant 0 : i32
    return %c0_i32, %c0_i32_0 : i32, i32
  }
  func.func @transform_3(%arg0: i32, %arg1: i32, %arg2: i32) -> (i32, i32) {
    %c0_i32 = arith.constant 0 : i32
    return %arg2, %arg1 : i32, i32
  }
  func.func @transform_4(%arg0: i32, %arg1: i32, %arg2: i32) -> (i32, i32) {
    %c0_i32 = arith.constant 0 : i32
    %c0_i32_0 = arith.constant 0 : i32
    return %c0_i32, %arg1 : i32, i32
  }
  func.func @transform_5(%arg0: i32, %arg1: i32, %arg2: i32) -> (i32, i32) {
    %c0_i32 = arith.constant 0 : i32
    return %arg0, %arg1 : i32, i32
  }
}

module attributes {stable_mosaic.version = 11 : i64} {
  func.func @_attention_kernel(%arg0: i32, %arg1: i32, %arg2: i32, %arg3: memref<1x1x8x8xbf16, #tpu.memory_space<vmem>>, %arg4: memref<1x1x8x8xbf16, #tpu.memory_space<vmem>>, %arg5: memref<1x1x8x8xbf16, #tpu.memory_space<vmem>>, %arg6: memref<1x1x8x8xbf16, #tpu.memory_space<vmem>>, %arg7: memref<1x1x8x8xbf16, #tpu.memory_space<vmem>>) attributes {dimension_semantics = [#tpu.dimension_semantics<parallel>, #tpu.dimension_semantics<parallel>, #tpu.dimension_semantics<parallel>], iteration_bounds = array<i64: 2, 4, 1>, scalar_prefetch = 0 : i64, scratch_operands = 0 : i64, tpu.core_type = #tpu.core_type<tc>, window_params = [{transform_indices = @transform_0, window_bounds = array<i64: 1, 1, 8, 8>}, {transform_indices = @transform_1, window_bounds = array<i64: 1, 1, 8, 8>}, {transform_indices = @transform_2, window_bounds = array<i64: 1, 1, 8, 8>}, {transform_indices = @transform_3, window_bounds = array<i64: 1, 1, 8, 8>}, {transform_indices = @transform_4, window_bounds = array<i64: 1, 1, 8, 8>}]} {
    %c0 = arith.constant 0 : index
    %c0_0 = arith.constant 0 : index
    %c0_1 = arith.constant 0 : index
    %c0_2 = arith.constant 0 : index
    %0 = vector.load %arg3[%c0, %c0_0, %c0_1, %c0_2] : memref<1x1x8x8xbf16, #tpu.memory_space<vmem>>, vector<1x1x8x8xbf16>
    %1 = vector.shape_cast %0 : vector<1x1x8x8xbf16> to vector<8x8xbf16>
    %2 = arith.extf %1 : vector<8x8xbf16> to vector<8x8xf32>
    %cst = arith.constant 0.353553385 : f32
    %3 = vector.broadcast %cst : f32 to vector<8x8xf32>
    %4 = arith.mulf %2, %3 : vector<8x8xf32>
    %5 = arith.truncf %4 : vector<8x8xf32> to vector<8x8xbf16>
    %c0_3 = arith.constant 0 : index
    %c0_4 = arith.constant 0 : index
    %c0_5 = arith.constant 0 : index
    %c0_6 = arith.constant 0 : index
    %6 = vector.load %arg4[%c0_3, %c0_4, %c0_5, %c0_6] : memref<1x1x8x8xbf16, #tpu.memory_space<vmem>>, vector<1x1x8x8xbf16>
    %7 = vector.shape_cast %6 : vector<1x1x8x8xbf16> to vector<8x8xbf16>
    %c0_7 = arith.constant 0 : index
    %c0_8 = arith.constant 0 : index
    %c0_9 = arith.constant 0 : index
    %c0_10 = arith.constant 0 : index
    %8 = vector.load %arg5[%c0_7, %c0_8, %c0_9, %c0_10] : memref<1x1x8x8xbf16, #tpu.memory_space<vmem>>, vector<1x1x8x8xbf16>
    %9 = vector.shape_cast %8 : vector<1x1x8x8xbf16> to vector<8x8xbf16>
    "tpu.trace_start"() <{level = 10 : i32, message = "qd,kd->qk"}> : () -> ()
    %cst_11 = arith.constant dense<0.000000e+00> : vector<8x8xf32>
    %10 = tpu.matmul %5, %7, %cst_11 {dimension_numbers = #tpu.dot_dimension_numbers<[1], [1], [0], [0], [0, 0, 1, 0], [], []>} : vector<8x8xbf16>, vector<8x8xbf16>, vector<8x8xf32> -> vector<8x8xf32>
    "tpu.trace_stop"() : () -> ()
    %c8_i32 = arith.constant 8 : i32
    %11 = arith.muli %arg2, %c8_i32 : i32
    %12 = tpu.iota {dimensions = array<i32: 0>} : vector<8x8xi32>
    %13 = vector.broadcast %11 : i32 to vector<8x8xi32>
    %14 = arith.addi %13, %12 : vector<8x8xi32>
    %15 = tpu.iota {dimensions = array<i32: 1>} : vector<8x8xi32>
    %16 = arith.cmpi sle, %15, %14 : vector<8x8xi32>
    %cst_12 = arith.constant 0xFF800000 : f32
    %17 = vector.broadcast %cst_12 : f32 to vector<8x8xf32>
    %18 = arith.select %16, %10, %17 : vector<8x8xi1>, vector<8x8xf32>
    %19 = arith.truncf %18 : vector<8x8xf32> to vector<8x8xbf16>
    %c0_13 = arith.constant 0 : index
    %c0_14 = arith.constant 0 : index
    %c0_15 = arith.constant 0 : index
    %c0_16 = arith.constant 0 : index
    %20 = vector.load %arg7[%c0_13, %c0_14, %c0_15, %c0_16] : memref<1x1x8x8xbf16, #tpu.memory_space<vmem>>, vector<1x1x8x8xbf16>
    %21 = vector.shape_cast %20 : vector<1x1x8x8xbf16> to vector<8x8xbf16>
    %22 = vector.shape_cast %19 : vector<8x8xbf16> to vector<1x1x8x8xbf16>
    tpu.vector_store %arg7[%c0_13, %c0_14, %c0_15, %c0_16], %22 {strides = array<i32>} : memref<1x1x8x8xbf16, #tpu.memory_space<vmem>>, vector<1x1x8x8xbf16>,
    %cst_17 = arith.constant dense<0xFF800000> : vector<8xf32>
    %23 = vector.multi_reduction <maximumf>, %18, %cst_17 [1] : vector<8x8xf32> to vector<8xf32>
    %24 = vector.shape_cast %23 : vector<8xf32> to vector<8x1xf32>
    %25 = vector.broadcast %24 : vector<8x1xf32> to vector<8x8xf32>
    %26 = arith.subf %18, %25 : vector<8x8xf32>
    %27 = math.exp %26 : vector<8x8xf32>
    %cst_18 = arith.constant dense<0.000000e+00> : vector<8xf32>
    %28 = vector.multi_reduction <add>, %27, %cst_18 [1] : vector<8x8xf32> to vector<8xf32>
    %29 = vector.shape_cast %28 : vector<8xf32> to vector<8x1xf32>
    %30 = tpu.reciprocal %29 {approx = true} : vector<8x1xf32> -> vector<8x1xf32>
    %31 = vector.broadcast %30 : vector<8x1xf32> to vector<8x8xf32>
    %32 = arith.mulf %27, %31 : vector<8x8xf32>
    %33 = arith.truncf %32 : vector<8x8xf32> to vector<8x8xbf16>
    %cst_19 = arith.constant dense<0.000000e+00> : vector<8x8xf32>
    %34 = tpu.matmul %33, %9, %cst_19 {dimension_numbers = #tpu.dot_dimension_numbers<[1], [0], [0], [1], [0, 0, 1, 1], [], []>} : vector<8x8xbf16>, vector<8x8xbf16>, vector<8x8xf32> -> vector<8x8xf32>
    %35 = arith.truncf %34 : vector<8x8xf32> to vector<8x8xbf16>
    %c0_20 = arith.constant 0 : index
    %c0_21 = arith.constant 0 : index
    %c0_22 = arith.constant 0 : index
    %c0_23 = arith.constant 0 : index
    %36 = vector.load %arg6[%c0_20, %c0_21, %c0_22, %c0_23] : memref<1x1x8x8xbf16, #tpu.memory_space<vmem>>, vector<1x1x8x8xbf16>
    %37 = vector.shape_cast %36 : vector<1x1x8x8xbf16> to vector<8x8xbf16>
    %38 = vector.shape_cast %35 : vector<8x8xbf16> to vector<1x1x8x8xbf16>
    tpu.vector_store %arg6[%c0_20, %c0_21, %c0_22, %c0_23], %38 {strides = array<i32>} : memref<1x1x8x8xbf16, #tpu.memory_space<vmem>>, vector<1x1x8x8xbf16>,
    return
  }
  func.func @transform_0(%arg0: i32, %arg1: i32, %arg2: i32) -> (i32, i32, i32, i32) {
    %c0_i32 = arith.constant 0 : i32
    %c0_i32_0 = arith.constant 0 : i32
    return %arg0, %arg1, %arg2, %c0_i32 : i32, i32, i32, i32
  }
  func.func @transform_1(%arg0: i32, %arg1: i32, %arg2: i32) -> (i32, i32, i32, i32) {
    %c0_i32 = arith.constant 0 : i32
    %c0_i32_0 = arith.constant 0 : i32
    %c0_i32_1 = arith.constant 0 : i32
    return %arg0, %arg1, %c0_i32, %c0_i32_0 : i32, i32, i32, i32
  }
  func.func @transform_2(%arg0: i32, %arg1: i32, %arg2: i32) -> (i32, i32, i32, i32) {
    %c0_i32 = arith.constant 0 : i32
    %c0_i32_0 = arith.constant 0 : i32
    %c0_i32_1 = arith.constant 0 : i32
    return %arg0, %arg1, %c0_i32, %c0_i32_0 : i32, i32, i32, i32
  }
  func.func @transform_3(%arg0: i32, %arg1: i32, %arg2: i32) -> (i32, i32, i32, i32) {
    %c0_i32 = arith.constant 0 : i32
    %c0_i32_0 = arith.constant 0 : i32
    return %arg0, %arg1, %arg2, %c0_i32 : i32, i32, i32, i32
  }
  func.func @transform_4(%arg0: i32, %arg1: i32, %arg2: i32) -> (i32, i32, i32, i32) {
    %c0_i32 = arith.constant 0 : i32
    %c0_i32_0 = arith.constant 0 : i32
    return %arg0, %arg1, %arg2, %c0_i32 : i32, i32, i32, i32
  }
}

module attributes {stable_mosaic.version = 11 : i64} {
  func.func @_matmul_residual_kernel(%arg0: i32, %arg1: i32, %arg2: i32, %arg3: memref<16x32xbf16, #tpu.memory_space<vmem>>, %arg4: memref<32x32xbf16, #tpu.memory_space<vmem>>, %arg5: memref<1x32xf32, #tpu.memory_space<vmem>>, %arg6: memref<16x32xf32, #tpu.memory_space<vmem>>, %arg7: memref<16x32xf32, #tpu.memory_space<vmem>>, %arg8: memref<16x32xf32, #tpu.memory_space<vmem>>) attributes {dimension_semantics = [#tpu.dimension_semantics<parallel>, #tpu.dimension_semantics<parallel>, #tpu.dimension_semantics<arbitrary>], iteration_bounds = array<i64: 1, 1, 1>, scalar_prefetch = 0 : i64, scratch_operands = 1 : i64, tpu.core_type = #tpu.core_type<tc>, window_params = [{transform_indices = @transform_0, window_bounds = array<i64: 16, 32>}, {transform_indices = @transform_1, window_bounds = array<i64: 32, 32>}, {transform_indices = @transform_2, window_bounds = array<i64: 1, 32>}, {transform_indices = @transform_3, window_bounds = array<i64: 16, 32>}, {transform_indices = @transform_4, window_bounds = array<i64: 16, 32>}]} {
    %c0_i32 = arith.constant 0 : i32
    %0 = arith.cmpi eq, %arg2, %c0_i32 : i32
    %1 = arith.extui %0 : i1 to i32
    %c0_i32_0 = arith.constant 0 : i32
    %2 = arith.cmpi ne, %1, %c0_i32_0 : i32
    scf.if %2 {
      %cst_10 = arith.constant 0.000000e+00 : f32
      %12 = vector.broadcast %cst_10 : f32 to vector<16x32xf32>
      %c0_11 = arith.constant 0 : index
      %c0_12 = arith.constant 0 : index
      %13 = vector.load %arg8[%c0_11, %c0_12] : memref<16x32xf32, #tpu.memory_space<vmem>>, vector<16x32xf32>
      tpu.vector_store %arg8[%c0_11, %c0_12], %12 {strides = array<i32>} : memref<16x32xf32, #tpu.memory_space<vmem>>, vector<16x32xf32>,
    } else {
    }
    %c0 = arith.constant 0 : index
    %c0_1 = arith.constant 0 : index
    %3 = vector.load %arg8[%c0, %c0_1] : memref<16x32xf32, #tpu.memory_space<vmem>>, vector<16x32xf32>
    %c0_2 = arith.constant 0 : index
    %c0_3 = arith.constant 0 : index
    %4 = vector.load %arg3[%c0_2, %c0_3] : memref<16x32xbf16, #tpu.memory_space<vmem>>, vector<16x32xbf16>
    %c0_4 = arith.constant 0 : index
    %c0_5 = arith.constant 0 : index
    %5 = vector.load %arg4[%c0_4, %c0_5] : memref<32x32xbf16, #tpu.memory_space<vmem>>, vector<32x32xbf16>
    %cst = arith.constant dense<0.000000e+00> : vector<16x32xf32>
    %6 = tpu.matmul %4, %5, %cst {dimension_numbers = #tpu.dot_dimension_numbers<[1], [0], [0], [1], [0, 0, 1, 1], [], []>} : vector<16x32xbf16>, vector<32x32xbf16>, vector<16x32xf32> -> vector<16x32xf32>
    %7 = arith.addf %3, %6 : vector<16x32xf32>
    %c0_6 = arith.constant 0 : index
    %c0_7 = arith.constant 0 : index
    %8 = vector.load %arg8[%c0_6, %c0_7] : memref<16x32xf32, #tpu.memory_space<vmem>>, vector<16x32xf32>
    tpu.vector_store %arg8[%c0_6, %c0_7], %7 {strides = array<i32>} : memref<16x32xf32, #tpu.memory_space<vmem>>, vector<16x32xf32>,
    %c0_i32_8 = arith.constant 0 : i32
    %9 = arith.cmpi eq, %arg2, %c0_i32_8 : i32
    %10 = arith.extui %9 : i1 to i32
    %c0_i32_9 = arith.constant 0 : i32
    %11 = arith.cmpi ne, %10, %c0_i32_9 : i32
    scf.if %11 {
      %c0_10 = arith.constant 0 : index
      %c0_11 = arith.constant 0 : index
      %12 = vector.load %arg8[%c0_10, %c0_11] : memref<16x32xf32, #tpu.memory_space<vmem>>, vector<16x32xf32>
      %c0_12 = arith.constant 0 : index
      %c0_13 = arith.constant 0 : index
      %13 = vector.load %arg5[%c0_12, %c0_13] : memref<1x32xf32, #tpu.memory_space<vmem>>, vector<1x32xf32>
      %14 = vector.broadcast %13 : vector<1x32xf32> to vector<16x32xf32>
      %15 = arith.addf %12, %14 : vector<16x32xf32>
      %c0_14 = arith.constant 0 : index
      %c0_15 = arith.constant 0 : index
      %16 = vector.load %arg6[%c0_14, %c0_15] : memref<16x32xf32, #tpu.memory_space<vmem>>, vector<16x32xf32>
      %17 = arith.addf %15, %16 : vector<16x32xf32>
      %c0_16 = arith.constant 0 : index
      %c0_17 = arith.constant 0 : index
      %18 = vector.load %arg7[%c0_16, %c0_17] : memref<16x32xf32, #tpu.memory_space<vmem>>, vector<16x32xf32>
      tpu.vector_store %arg7[%c0_16, %c0_17], %17 {strides = array<i32>} : memref<16x32xf32, #tpu.memory_space<vmem>>, vector<16x32xf32>,
    } else {
    }
    return
  }
  func.func @transform_0(%arg0: i32, %arg1: i32, %arg2: i32) -> (i32, i32) {
    %c0_i32 = arith.constant 0 : i32
    return %arg0, %arg2 : i32, i32
  }
  func.func @transform_1(%arg0: i32, %arg1: i32, %arg2: i32) -> (i32, i32) {
    %c0_i32 = arith.constant 0 : i32
    return %arg2, %arg1 : i32, i32
  }
  func.func @transform_2(%arg0: i32, %arg1: i32, %arg2: i32) -> (i32, i32) {
    %c0_i32 = arith.constant 0 : i32
    %c0_i32_0 = arith.constant 0 : i32
    return %c0_i32, %arg1 : i32, i32
  }
  func.func @transform_3(%arg0: i32, %arg1: i32, %arg2: i32) -> (i32, i32) {
    %c0_i32 = arith.constant 0 : i32
    return %arg0, %arg1 : i32, i32
  }
  func.func @transform_4(%arg0: i32, %arg1: i32, %arg2: i32) -> (i32, i32) {
    %c0_i32 = arith.constant 0 : i32
    return %arg0, %arg1 : i32, i32
  }
}

module attributes {stable_mosaic.version = 11 : i64} {
  func.func @kernel(%arg0: i32, %arg1: i32, %arg2: i32, %arg3: memref<16x32xf32, #tpu.memory_space<vmem>>, %arg4: memref<1x32xf32, #tpu.memory_space<vmem>>, %arg5: memref<1x32xf32, #tpu.memory_space<vmem>>, %arg6: memref<32x128xbf16, #tpu.memory_space<vmem>>, %arg7: memref<1x128xf32, #tpu.memory_space<vmem>>, %arg8: memref<16x128xbf16, #tpu.memory_space<vmem>>, %arg9: memref<1x16x32xbf16, #tpu.memory_space<vmem>>, %arg10: memref<16x128xf32, #tpu.memory_space<vmem>>) attributes {dimension_semantics = [#tpu.dimension_semantics<parallel>, #tpu.dimension_semantics<parallel>, #tpu.dimension_semantics<arbitrary>], iteration_bounds = array<i64: 1, 1, 1>, scalar_prefetch = 0 : i64, scratch_operands = 2 : i64, tpu.core_type = #tpu.core_type<tc>, window_params = [{transform_indices = @transform_0, window_bounds = array<i64: 16, 32>}, {pipeline_mode = #tpu.pipeline_mode<synchronous>, transform_indices = @transform_1, window_bounds = array<i64: 1, 32>}, {pipeline_mode = #tpu.pipeline_mode<synchronous>, transform_indices = @transform_2, window_bounds = array<i64: 1, 32>}, {transform_indices = @transform_3, window_bounds = array<i64: 32, 128>}, {transform_indices = @transform_4, window_bounds = array<i64: 1, 128>}, {transform_indices = @transform_5, window_bounds = array<i64: 16, 128>}]} {
    %c0_i32 = arith.constant 0 : i32
    %0 = arith.cmpi eq, %arg2, %c0_i32 : i32
    %1 = arith.extui %0 : i1 to i32
    %c0_i32_0 = arith.constant 0 : i32
    %2 = arith.cmpi ne, %1, %c0_i32_0 : i32
    scf.if %2 {
      %c0_10 = arith.constant 0 : index
      %c0_11 = arith.constant 0 : index
      %14 = vector.load %arg3[%c0_10, %c0_11] : memref<16x32xf32, #tpu.memory_space<vmem>>, vector<16x32xf32>
      %cst_12 = arith.constant dense<0.000000e+00> : vector<16xf32>
      %15 = vector.multi_reduction <add>, %14, %cst_12 [1] : vector<16x32xf32> to vector<16xf32>
      %16 = vector.shape_cast %15 : vector<16xf32> to vector<16x1xf32>
      %cst_13 = arith.constant 3.200000e+01 : f32
      %17 = vector.broadcast %cst_13 : f32 to vector<16x1xf32>
      %18 = arith.divf %16, %17 : vector<16x1xf32>
      %19 = vector.broadcast %18 : vector<16x1xf32> to vector<16x32xf32>
      %20 = arith.subf %14, %19 : vector<16x32xf32>
      %21 = arith.mulf %20, %20 : vector<16x32xf32>
      %cst_14 = arith.constant dense<0.000000e+00> : vector<16xf32>
      %22 = vector.multi_reduction <add>, %21, %cst_14 [1] : vector<16x32xf32> to vector<16xf32>
      %23 = vector.shape_cast %22 : vector<16xf32> to vector<16x1xf32>
      %cst_15 = arith.constant 3.200000e+01 : f32
      %24 = vector.broadcast %cst_15 : f32 to vector<16x1xf32>
      %25 = arith.divf %23, %24 : vector<16x1xf32>
      %26 = vector.broadcast %18 : vector<16x1xf32> to vector<16x32xf32>
      %27 = arith.subf %14, %26 : vector<16x32xf32>
      %cst_16 = arith.constant 9.99999974E-6 : f32
      %28 = vector.broadcast %cst_16 : f32 to vector<16x1xf32>
      %29 = arith.addf %25, %28 : vector<16x1xf32>
      %30 = math.rsqrt %29 : vector<16x1xf32>
      %31 = vector.broadcast %30 : vector<16x1xf32> to vector<16x32xf32>
      %32 = arith.mulf %27, %31 : vector<16x32xf32>
      %c0_17 = arith.constant 0 : index
      %c0_18 = arith.constant 0 : index
      %33 = vector.load %arg4[%c0_17, %c0_18] : memref<1x32xf32, #tpu.memory_space<vmem>>, vector<1x32xf32>
      %34 = vector.broadcast %33 : vector<1x32xf32> to vector<16x32xf32>
      %35 = arith.mulf %32, %34 : vector<16x32xf32>
      %c0_19 = arith.constant 0 : index
      %c0_20 = arith.constant 0 : index
      %36 = vector.load %arg5[%c0_19, %c0_20] : memref<1x32xf32, #tpu.memory_space<vmem>>, vector<1x32xf32>
      %37 = vector.broadcast %36 : vector<1x32xf32> to vector<16x32xf32>
      %38 = arith.addf %35, %37 : vector<16x32xf32>
      %39 = arith.truncf %38 : vector<16x32xf32> to vector<16x32xbf16>
      %c0_21 = arith.constant 0 : index
      %c0_22 = arith.constant 0 : index
      %c0_23 = arith.constant 0 : index
      %40 = vector.load %arg9[%c0_21, %c0_22, %c0_23] : memref<1x16x32xbf16, #tpu.memory_space<vmem>>, vector<1x16x32xbf16>
      %41 = vector.shape_cast %40 : vector<1x16x32xbf16> to vector<16x32xbf16>
      %42 = vector.shape_cast %39 : vector<16x32xbf16> to vector<1x16x32xbf16>
      tpu.vector_store %arg9[%c0_21, %c0_22, %c0_23], %42 {strides = array<i32>} : memref<1x16x32xbf16, #tpu.memory_space<vmem>>, vector<1x16x32xbf16>,
      %cst_24 = arith.constant 0.000000e+00 : f32
      %43 = vector.broadcast %cst_24 : f32 to vector<16x128xf32>
      %c0_25 = arith.constant 0 : index
      %c0_26 = arith.constant 0 : index
      %44 = vector.load %arg10[%c0_25, %c0_26] : memref<16x128xf32, #tpu.memory_space<vmem>>, vector<16x128xf32>
      tpu.vector_store %arg10[%c0_25, %c0_26], %43 {strides = array<i32>} : memref<16x128xf32, #tpu.memory_space<vmem>>, vector<16x128xf32>,
    } else {
    }
    %c0 = arith.constant 0 : index
    %c0_1 = arith.constant 0 : index
    %3 = vector.load %arg10[%c0, %c0_1] : memref<16x128xf32, #tpu.memory_space<vmem>>, vector<16x128xf32>
    %4 = arith.index_cast %arg2 : i32 to index
    %c0_2 = arith.constant 0 : index
    %c0_3 = arith.constant 0 : index
    %5 = vector.load %arg9[%4, %c0_2, %c0_3] : memref<1x16x32xbf16, #tpu.memory_space<vmem>>, vector<1x16x32xbf16>
    %6 = vector.shape_cast %5 : vector<1x16x32xbf16> to vector<16x32xbf16>
    %c0_4 = arith.constant 0 : index
    %c0_5 = arith.constant 0 : index
    %7 = vector.load %arg6[%c0_4, %c0_5] : memref<32x128xbf16, #tpu.memory_space<vmem>>, vector<32x128xbf16>
    %cst = arith.constant dense<0.000000e+00> : vector<16x128xf32>
    %8 = tpu.matmul %6, %7, %cst {dimension_numbers = #tpu.dot_dimension_numbers<[1], [0], [0], [1], [0, 0, 1, 1], [], []>} : vector<16x32xbf16>, vector<32x128xbf16>, vector<16x128xf32> -> vector<16x128xf32>
    %9 = arith.addf %3, %8 : vector<16x128xf32>
    %c0_6 = arith.constant 0 : index
    %c0_7 = arith.constant 0 : index
    %10 = vector.load %arg10[%c0_6, %c0_7] : memref<16x128xf32, #tpu.memory_space<vmem>>, vector<16x128xf32>
    tpu.vector_store %arg10[%c0_6, %c0_7], %9 {strides = array<i32>} : memref<16x128xf32, #tpu.memory_space<vmem>>, vector<16x128xf32>,
    %c0_i32_8 = arith.constant 0 : i32
    %11 = arith.cmpi eq, %arg2, %c0_i32_8 : i32
    %12 = arith.extui %11 : i1 to i32
    %c0_i32_9 = arith.constant 0 : i32
    %13 = arith.cmpi ne, %12, %c0_i32_9 : i32
    scf.if %13 {
      %c0_10 = arith.constant 0 : index
      %c0_11 = arith.constant 0 : index
      %14 = vector.load %arg10[%c0_10, %c0_11] : memref<16x128xf32, #tpu.memory_space<vmem>>, vector<16x128xf32>
      %c0_12 = arith.constant 0 : index
      %c0_13 = arith.constant 0 : index
      %15 = vector.load %arg7[%c0_12, %c0_13] : memref<1x128xf32, #tpu.memory_space<vmem>>, vector<1x128xf32>
      %16 = vector.broadcast %15 : vector<1x128xf32> to vector<16x128xf32>
      %17 = arith.addf %14, %16 : vector<16x128xf32>
      %cst_14 = arith.constant 5.000000e-01 : f32
      %18 = vector.broadcast %cst_14 : f32 to vector<16x128xf32>
      %19 = arith.mulf %18, %17 : vector<16x128xf32>
      %cst_15 = arith.constant 4.471500e-02 : f32
      %20 = vector.broadcast %cst_15 : f32 to vector<16x128xf32>
      %21 = arith.mulf %20, %17 : vector<16x128xf32>
      %22 = arith.mulf %21, %17 : vector<16x128xf32>
      %23 = arith.mulf %22, %17 : vector<16x128xf32>
      %24 = arith.addf %17, %23 : vector<16x128xf32>
      %cst_16 = arith.constant 0.797884583 : f32
      %25 = vector.broadcast %cst_16 : f32 to vector<16x128xf32>
      %26 = arith.mulf %25, %24 : vector<16x128xf32>
      %27 = math.tanh %26 : vector<16x128xf32>
      %cst_17 = arith.constant 1.000000e+00 : f32
      %28 = vector.broadcast %cst_17 : f32 to vector<16x128xf32>
      %29 = arith.addf %28, %27 : vector<16x128xf32>
      %30 = arith.mulf %19, %29 : vector<16x128xf32>
      %31 = arith.truncf %30 : vector<16x128xf32> to vector<16x128xbf16>
      %c0_18 = arith.constant 0 : index
      %c0_19 = arith.constant 0 : index
      %32 = vector.load %arg8[%c0_18, %c0_19] : memref<16x128xbf16, #tpu.memory_space<vmem>>, vector<16x128xbf16>
      tpu.vector_store %arg8[%c0_18, %c0_19], %31 {strides = array<i32>} : memref<16x128xbf16, #tpu.memory_space<vmem>>, vector<16x128xbf16>,
    } else {
    }
    return
  }
  func.func @transform_0(%arg0: i32, %arg1: i32, %arg2: i32) -> (i32, i32) {
    %c0_i32 = arith.constant 0 : i32
    %c0_i32_0 = arith.constant 0 : i32
    return %arg0, %c0_i32 : i32, i32
  }
  func.func @transform_1(%arg0: i32, %arg1: i32, %arg2: i32) -> (i32, i32) {
    %c0_i32 = arith.constant 0 : i32
    %c0_i32_0 = arith.constant 0 : i32
    %c0_i32_1 = arith.constant 0 : i32
    return %c0_i32, %c0_i32_0 : i32, i32
  }
  func.func @transform_2(%arg0: i32, %arg1: i32, %arg2: i32) -> (i32, i32) {
    %c0_i32 = arith.constant 0 : i32
    %c0_i32_0 = arith.constant 0 : i32
    %c0_i32_1 = arith.constant 0 : i32
    return %c0_i32, %c0_i32_0 : i32, i32
  }
  func.func @transform_3(%arg0: i32, %arg1: i32, %arg2: i32) -> (i32, i32) {
    %c0_i32 = arith.constant 0 : i32
    return %arg2, %arg1 : i32, i32
  }
  func.func @transform_4(%arg0: i32, %arg1: i32, %arg2: i32) -> (i32, i32) {
    %c0_i32 = arith.constant 0 : i32
    %c0_i32_0 = arith.constant 0 : i32
    return %c0_i32, %arg1 : i32, i32
  }
  func.func @transform_5(%arg0: i32, %arg1: i32, %arg2: i32) -> (i32, i32) {
    %c0_i32 = arith.constant 0 : i32
    return %arg0, %arg1 : i32, i32
  }
}

module attributes {stable_mosaic.version = 11 : i64} {
  func.func @_matmul_residual_kernel(%arg0: i32, %arg1: i32, %arg2: i32, %arg3: memref<16x128xbf16, #tpu.memory_space<vmem>>, %arg4: memref<128x32xbf16, #tpu.memory_space<vmem>>, %arg5: memref<1x32xf32, #tpu.memory_space<vmem>>, %arg6: memref<16x32xf32, #tpu.memory_space<vmem>>, %arg7: memref<16x32xf32, #tpu.memory_space<vmem>>, %arg8: memref<16x32xf32, #tpu.memory_space<vmem>>) attributes {dimension_semantics = [#tpu.dimension_semantics<parallel>, #tpu.dimension_semantics<parallel>, #tpu.dimension_semantics<arbitrary>], iteration_bounds = array<i64: 1, 1, 1>, scalar_prefetch = 0 : i64, scratch_operands = 1 : i64, tpu.core_type = #tpu.core_type<tc>, window_params = [{transform_indices = @transform_0, window_bounds = array<i64: 16, 128>}, {transform_indices = @transform_1, window_bounds = array<i64: 128, 32>}, {transform_indices = @transform_2, window_bounds = array<i64: 1, 32>}, {transform_indices = @transform_3, window_bounds = array<i64: 16, 32>}, {transform_indices = @transform_4, window_bounds = array<i64: 16, 32>}]} {
    %c0_i32 = arith.constant 0 : i32
    %0 = arith.cmpi eq, %arg2, %c0_i32 : i32
    %1 = arith.extui %0 : i1 to i32
    %c0_i32_0 = arith.constant 0 : i32
    %2 = arith.cmpi ne, %1, %c0_i32_0 : i32
    scf.if %2 {
      %cst_10 = arith.constant 0.000000e+00 : f32
      %12 = vector.broadcast %cst_10 : f32 to vector<16x32xf32>
      %c0_11 = arith.constant 0 : index
      %c0_12 = arith.constant 0 : index
      %13 = vector.load %arg8[%c0_11, %c0_12] : memref<16x32xf32, #tpu.memory_space<vmem>>, vector<16x32xf32>
      tpu.vector_store %arg8[%c0_11, %c0_12], %12 {strides = array<i32>} : memref<16x32xf32, #tpu.memory_space<vmem>>, vector<16x32xf32>,
    } else {
    }
    %c0 = arith.constant 0 : index
    %c0_1 = arith.constant 0 : index
    %3 = vector.load %arg8[%c0, %c0_1] : memref<16x32xf32, #tpu.memory_space<vmem>>, vector<16x32xf32>
    %c0_2 = arith.constant 0 : index
    %c0_3 = arith.constant 0 : index
    %4 = vector.load %arg3[%c0_2, %c0_3] : memref<16x128xbf16, #tpu.memory_space<vmem>>, vector<16x128xbf16>
    %c0_4 = arith.constant 0 : index
    %c0_5 = arith.constant 0 : index
    %5 = vector.load %arg4[%c0_4, %c0_5] : memref<128x32xbf16, #tpu.memory_space<vmem>>, vector<128x32xbf16>
    %cst = arith.constant dense<0.000000e+00> : vector<16x32xf32>
    %6 = tpu.matmul %4, %5, %cst {dimension_numbers = #tpu.dot_dimension_numbers<[1], [0], [0], [1], [0, 0, 1, 1], [], []>} : vector<16x128xbf16>, vector<128x32xbf16>, vector<16x32xf32> -> vector<16x32xf32>
    %7 = arith.addf %3, %6 : vector<16x32xf32>
    %c0_6 = arith.constant 0 : index
    %c0_7 = arith.constant 0 : index
    %8 = vector.load %arg8[%c0_6, %c0_7] : memref<16x32xf32, #tpu.memory_space<vmem>>, vector<16x32xf32>
    tpu.vector_store %arg8[%c0_6, %c0_7], %7 {strides = array<i32>} : memref<16x32xf32, #tpu.memory_space<vmem>>, vector<16x32xf32>,
    %c0_i32_8 = arith.constant 0 : i32
    %9 = arith.cmpi eq, %arg2, %c0_i32_8 : i32
    %10 = arith.extui %9 : i1 to i32
    %c0_i32_9 = arith.constant 0 : i32
    %11 = arith.cmpi ne, %10, %c0_i32_9 : i32
    scf.if %11 {
      %c0_10 = arith.constant 0 : index
      %c0_11 = arith.constant 0 : index
      %12 = vector.load %arg8[%c0_10, %c0_11] : memref<16x32xf32, #tpu.memory_space<vmem>>, vector<16x32xf32>
      %c0_12 = arith.constant 0 : index
      %c0_13 = arith.constant 0 : index
      %13 = vector.load %arg5[%c0_12, %c0_13] : memref<1x32xf32, #tpu.memory_space<vmem>>, vector<1x32xf32>
      %14 = vector.broadcast %13 : vector<1x32xf32> to vector<16x32xf32>
      %15 = arith.addf %12, %14 : vector<16x32xf32>
      %c0_14 = arith.constant 0 : index
      %c0_15 = arith.constant 0 : index
      %16 = vector.load %arg6[%c0_14, %c0_15] : memref<16x32xf32, #tpu.memory_space<vmem>>, vector<16x32xf32>
      %17 = arith.addf %15, %16 : vector<16x32xf32>
      %c0_16 = arith.constant 0 : index
      %c0_17 = arith.constant 0 : index
      %18 = vector.load %arg7[%c0_16, %c0_17] : memref<16x32xf32, #tpu.memory_space<vmem>>, vector<16x32xf32>
      tpu.vector_store %arg7[%c0_16, %c0_17], %17 {strides = array<i32>} : memref<16x32xf32, #tpu.memory_space<vmem>>, vector<16x32xf32>,
    } else {
    }
    return
  }
  func.func @transform_0(%arg0: i32, %arg1: i32, %arg2: i32) -> (i32, i32) {
    %c0_i32 = arith.constant 0 : i32
    return %arg0, %arg2 : i32, i32
  }
  func.func @transform_1(%arg0: i32, %arg1: i32, %arg2: i32) -> (i32, i32) {
    %c0_i32 = arith.constant 0 : i32
    return %arg2, %arg1 : i32, i32
  }
  func.func @transform_2(%arg0: i32, %arg1: i32, %arg2: i32) -> (i32, i32) {
    %c0_i32 = arith.constant 0 : i32
    %c0_i32_0 = arith.constant 0 : i32
    return %c0_i32, %arg1 : i32, i32
  }
  func.func @transform_3(%arg0: i32, %arg1: i32, %arg2: i32) -> (i32, i32) {
    %c0_i32 = arith.constant 0 : i32
    return %arg0, %arg1 : i32, i32
  }
  func.func @transform_4(%arg0: i32, %arg1: i32, %arg2: i32) -> (i32, i32) {
    %c0_i32 = arith.constant 0 : i32
    return %arg0, %arg1 : i32, i32
  }
}

</mosaic_0001>

<bundles_post_ra>
// kernel: block_forward.7
= control target key start
LH: loop header
LB: loop body
LE: loop exit
PB: predicated region body
PF: predicated region fallthrough
CT: control target
= control target key end

     0   :  { %vm22_vm0 = vcmask 261120   ;;  %v111_v1 = vmov 0.0   ;;  %s168_s1 = inlined_call_operand.vmem [shape: bf16[32,32], index: 1, kind: input, shape index: {}]   ;;  %s169_s2 = inlined_call_operand.vmem [shape: f32[1,32], index: 2, kind: input, shape index: {}]   ;;  %s170_s0 = inlined_call_operand.vmem [shape: bf16[16,32], index: 0, kind: input, shape index: {}]   ;;  %s171_s3 = inlined_call_operand.vmem [shape: f32[16,32], index: 3, kind: input, shape index: {}]   ;;  %s172_s4 = inlined_call_operand.vmem [shape: f32[16,32], index: 4, kind: output, shape index: {}]  }
   0x1   :  { %v108_v0 = vld [vmem:[%s168_s1 + $0x8] sm:$0xff]  ;;  %23 = vst.msk [vmem:[#allocation2] sm:$0xff] %vm22_vm0, %v111_v1  ;;  %v107_v2 = vld [vmem:[%s168_s1] sm:$0xff] }
   0x2   :  { %24 = vst.msk [vmem:[#allocation2 + $0x8] sm:$0xff] %vm22_vm0, %v111_v1  ;;  %60 = vmatpush.bf16.msra.mxu0 %v108_v0  ;;  %v106_v3 = vld [vmem:[%s170_s0] sm:$0xff]  ;;  %v84_v16 = vld [vmem:[%s171_s3 + $0x8] sm:$0xff] }
   0x3   :  { %v110_v8 = vld [vmem:[%s169_s2] ss:$0 sm:$0xff] }
   0x4   :  { %v83_v12 = vld [vmem:[%s171_s3] sm:$0xff] }
   0x6   :  { %61 = vmatpush.bf16.msra.mxu0 %v107_v2 }
   0x8   :  { %v25_v4 = vld [vmem:[#allocation2] sm:$0xff] }
   0x9   :  { %105 = vmatmul.msk.bf16.vlgmr.msra.gmra.mxu0 %vm22_vm0, %v106_v3  ;;  %v26_v7 = vld [vmem:[#allocation2 + $0x8] sm:$0xff] }
  0x86   :  { %v63_v5 = vpop.f32.mrf.mxu0 }
  0x87   :  { %v68_v6 = vadd.f32 %v63_v5, %v25_v4 }
  0x89   :  { %70 = vst.msk [vmem:[#allocation2] sm:$0xff] %vm22_vm0, %v68_v6 }
  0x8e   :  { %v65_v9 = vpop.f32.mrf.mxu0 }
  0x8f   :  { %v69_v10 = vadd.f32 %v65_v9, %v26_v7 }
  0x90   :  { %v75_v11 = vld [vmem:[#allocation2] sm:$0xff] }
  0x91   :  { %v81_v13 = vadd.f32 %v110_v8, %v75_v11  ;;  %71 = vst.msk [vmem:[#allocation2 + $0x8] sm:$0xff] %vm22_vm0, %v69_v10 }
  0x93   :  { %v85_v14 = vadd.f32 %v83_v12, %v81_v13 }
  0x95   :  { %87 = vst.msk [vmem:[%s172_s4] sm:$0xff] %vm22_vm0, %v85_v14 }
  0x98   :  { %v76_v15 = vld [vmem:[#allocation2 + $0x8] sm:$0xff] }
  0x99   :  { %v82_v17 = vadd.f32 %v110_v8, %v76_v15 }
  0x9b   :  { %v86_v18 = vadd.f32 %v84_v16, %v82_v17 }
  0x9d   :  { %88 = vst.msk [vmem:[%s172_s4 + $0x8] sm:$0xff] %vm22_vm0, %v86_v18 }

// kernel: block_forward.5
= control target key start
LH: loop header
LB: loop body
LE: loop exit
PB: predicated region body
PF: predicated region fallthrough
CT: control target
= control target key end

     0   :  { %10 = vsyncpa [#allocation5], 0  ;;  %s357_s0 = inlined_call_operand.hbm [shape: f32[16,32], index: 0, kind: input, shape index: {}]   ;;  %s358_s1 = inlined_call_operand.vmem [shape: f32[1,32], index: 1, kind: input, shape index: {}]   ;;  %s359_s2 = inlined_call_operand.vmem [shape: f32[1,32], index: 2, kind: input, shape index: {}]   ;;  %s360_s3 = inlined_call_operand.hbm [shape: bf16[32,96], index: 3, kind: input, shape index: {}]   ;;  %s361_s4 = inlined_call_operand.vmem [shape: f32[1,96], index: 4, kind: input, shape index: {}]   ;;  %s362_s5 = inlined_call_operand.vmem [shape: bf16[16,96], index: 5, kind: output, shape index: {}]  }
   0x1   :  { %s16_s20 = sshll.u32 %s357_s0, 4  ;;  %s17_s20 = int_to_ptr.hbm [resolvable:$true] %s16_s20 }
   0x2   :  { %11 = vsyncpa [#allocation7], 0  ;;  %s289_s21 = smov [#allocation4]   ;;  %s33_s25 = sshll.u32 %s360_s3, 4  ;;  %s34_s25 = int_to_ptr.hbm [resolvable:$true] %s33_s25 }
   0x3   :  { %s18_s22 = sshll.u32 %s289_s21, 4  ;;  %s290_s26 = smov 128   ;;  %s19_s22 = int_to_ptr.vmem [resolvable:$true] %s18_s22 }
   0x4   :  { %s291_s27 = smov 8   ;;  %s292_s28 = smov [#allocation6]  }
   0x5   :  { %24 = dma.hbm_to_vmem [thread:$0]  %s17_s20, 256, %s19_s22, [#allocation5], %s290_s26, %s290_s26, %s291_s27  }
   0x6   :  { %s35_s29 = sshll.u32 %s292_s28, 4  ;;  %s293_s30 = smov 64   ;;  %s36_s29 = int_to_ptr.vmem [resolvable:$true] %s35_s29 }
   0x7   :  { %s294_s6 = smov 4  }
   0x8   :  { %41 = dma.hbm_to_vmem [thread:$0]  %s34_s25, 256, %s36_s29, [#allocation7], %s293_s30, %s293_s30, %s294_s6  }
   0x9   :  { %285 = dma.done.wait [#allocation5], 256  }
   0xa   :  { %286 = vsyncadd [#allocation5], 4294967040 }
   0xb   :  { %287 = dma.done.wait [#allocation7], 256  }
   0xc   :  { %288 = vsyncadd [#allocation7], 4294967040  ;;  %vm59_vm0 = vcmask 261120   ;;  %v57_v0 = vld [vmem:[#allocation4] sm:$0xff]  ;;  %v58_v2 = vld [vmem:[#allocation4 + $0x8] sm:$0xff]  ;;  %v295_v4 = vmov 32.0  }
   0xd   :  { %v60_v1 = vsel %vm59_vm0, %v57_v0, 0.0  ;;  %v63_v3 = vsel %vm59_vm0, %v58_v2, 0.0  ;;  %231 = vrcp.f32 %v295_v4  ;;  %v219_v24 = vld [vmem:[#allocation6 + $0x8] sm:$0xff]  ;;  %v218_v27 = vld [vmem:[#allocation6] sm:$0xff]  ;;  %vm128_vm2 = vcmask 785408  }
   0xe   :  { %61 = vadd.xlane.f32.xlu0 %v60_v1  ;;  %169 = vmatpush.bf16.msra.mxu0 %v219_v24  ;;  %v296_v33 = vmov 0.0   ;;  %v228_v38 = vld [vmem:[%s358_s1] ss:$0 sm:$0xff]  ;;  %vm125_vm7 = vcmask 257024   ;;  %vm195_vm10 = vcmask 781312  }
   0xf   :  { %129 = vst.msk [vmem:[#allocation3] sm:$0xff] %vm128_vm2, %v296_v33  ;;  %v229_v41 = vld [vmem:[%s359_s2] ss:$0 sm:$0xff] }
  0x10   :  { %130 = vst.msk [vmem:[#allocation3 + $0x8] sm:$0xff] %vm128_vm2, %v296_v33  ;;  %v230_v59 = vld [vmem:[%s361_s4] ss:$0 sm:$0xff] }
  0x12   :  { %170 = vmatpush.bf16.msra.mxu0 %v218_v27 }
  0x13   :  { %v232_v5 = vpop.eup %231 }
  0x14   :  { %v67_v6 = vmul.f32 32.0, %v232_v5  ;;  %vm71_vm1 = vweird.f32 %v232_v5 }
  0x16   :  { %64 = vadd.xlane.f32.xlu0 %v63_v3  ;;  %v68_v7 = vsub.f32 1.0, %v67_v6  ;;  %v131_v55 = vld [vmem:[#allocation3] sm:$0xff] }
  0x17   :  { %v132_v58 = vld [vmem:[#allocation3 + $0x8] sm:$0xff] }
  0x18   :  { %v69_v8 = vmul.f32 %v232_v5, %v68_v7 }
  0x1a   :  { %v70_v9 = vadd.f32 %v232_v5, %v69_v8 }
  0x1c   :  { %v72_v10 = vsel %vm71_vm1, %v232_v5, %v70_v9 }
  0x81   :  { %v62_v11 = vpop.xlane.xlu0 %61 }
  0x82   :  { %v73_v12 = vmul.f32 %v72_v10, %v62_v11 }
  0x84   :  { %v75_v13 = vsub.f32 %v57_v0, %v73_v12 }
  0x86   :  { %v77_v14 = vmul.f32 %v75_v13, %v75_v13 }
  0x88   :  { %v79_v15 = vsel %vm59_vm0, %v77_v14, 0.0 }
  0x89   :  { %80 = vadd.xlane.f32.xlu1 %v79_v15  ;;  %v65_v16 = vpop.xlane.xlu0 %64 }
  0x8a   :  { %v74_v17 = vmul.f32 %v72_v10, %v65_v16 }
  0x8c   :  { %v76_v18 = vsub.f32 %v58_v2, %v74_v17 }
  0x8e   :  { %v78_v19 = vmul.f32 %v76_v18, %v76_v18 }
  0x90   :  { %v82_v20 = vsel %vm59_vm0, %v78_v19, 0.0 }
  0x91   :  { %83 = vadd.xlane.f32.xlu1 %v82_v20 }
  0xfc   :  { %v81_v21 = vpop.xlane.xlu1 %80 }
  0xfd   :  { %v85_v22 = vmul.f32 %v81_v21, %v72_v10 }
  0xff   :  { %v87_v23 = vadd.f32 1e-05, %v85_v22 }
 0x101   :  { %233 = vrsqrt.f32 %v87_v23  ;;  %vm95_vm4 = vweird.f32 %v87_v23 }
 0x104   :  { %v84_v25 = vpop.xlane.xlu1 %83 }
 0x105   :  { %v86_v26 = vmul.f32 %v84_v25, %v72_v10 }
 0x107   :  { %v234_v28 = vpop.eup %233  ;;  %v88_v29 = vadd.f32 1e-05, %v86_v26 }
 0x108   :  { %v90_v30 = vmul.f32 %v234_v28, %v87_v23  ;;  %vm96_vm3 = vweird.f32 %v234_v28 }
 0x109   :  { %235 = vrsqrt.f32 %v88_v29  ;;  %vm97_vm5 = vmor %vm95_vm4, %vm96_vm3  ;;  %vm105_vm8 = vweird.f32 %v88_v29 }
 0x10a   :  { %v91_v31 = vmul.f32 %v234_v28, %v90_v30 }
 0x10c   :  { %v92_v32 = vmul.f32 0.5, %v91_v31 }
 0x10e   :  { %v93_v34 = vsub.f32 1.5, %v92_v32 }
 0x10f   :  { %v236_v35 = vpop.eup %235 }
 0x110   :  { %v94_v36 = vmul.f32 %v234_v28, %v93_v34  ;;  %v100_v37 = vmul.f32 %v236_v35, %v88_v29  ;;  %vm106_vm6 = vweird.f32 %v236_v35 }
 0x111   :  { %vm107_vm9 = vmor %vm105_vm8, %vm106_vm6 }
 0x112   :  { %v98_v39 = vsel %vm97_vm5, %v234_v28, %v94_v36  ;;  %v101_v40 = vmul.f32 %v236_v35, %v100_v37 }
 0x113   :  { %v109_v42 = vmul.f32 %v98_v39, %v75_v13 }
 0x114   :  { %v102_v43 = vmul.f32 0.5, %v101_v40 }
 0x115   :  { %v115_v44 = vmul.f32 %v228_v38, %v109_v42 }
 0x116   :  { %v103_v45 = vsub.f32 1.5, %v102_v43 }
 0x117   :  { %v121_v46 = vadd.f32 %v229_v41, %v115_v44 }
 0x118   :  { %v104_v47 = vmul.f32 %v236_v35, %v103_v45 }
 0x119   :  { %v123_v48 = vpack.c.bf16 %v121_v46, %v121_v46 }
 0x11a   :  { %v108_v49 = vsel %vm107_vm9, %v236_v35, %v104_v47 }
 0x11b   :  { %126 = vst.msk [vmem:[#allocation2] sm:$0xf] %vm125_vm7, %v123_v48  ;;  %v110_v50 = vmul.f32 %v108_v49, %v76_v18 }
 0x11d   :  { %v116_v51 = vmul.f32 %v228_v38, %v110_v50 }
 0x11f   :  { %v122_v52 = vadd.f32 %v229_v41, %v116_v51 }
 0x121   :  { %v124_v53 = vpack.c.bf16 %v122_v52, %v122_v52 }
 0x123   :  { %127 = vst.msk [vmem:[#allocation2 + $0x4] sm:$0xf] %vm125_vm7, %v124_v53 }
 0x12a   :  { %v217_v54 = vld [vmem:[#allocation2] sm:$0xff] }
 0x12b   :  { %216 = vmatmul.msk.bf16.vlgmr.msra.gmra.mxu0 %vm59_vm0, %v217_v54 }
 0x1a8   :  { %v172_v56 = vpop.f32.mrf.mxu0 }
 0x1a9   :  { %v177_v57 = vadd.f32 %v172_v56, %v131_v55 }
 0x1ab   :  { %180 = vst.msk [vmem:[#allocation3] sm:$0xff] %vm128_vm2, %v177_v57 }
 0x1b0   :  { %v174_v60 = vpop.f32.mrf.mxu0 }
 0x1b1   :  { %v178_v61 = vadd.f32 %v174_v60, %v132_v58 }
 0x1b2   :  { %v185_v62 = vld [vmem:[#allocation3] sm:$0xff] }
 0x1b3   :  { %v191_v63 = vadd.f32 %v230_v59, %v185_v62  ;;  %181 = vst.msk [vmem:[#allocation3 + $0x8] sm:$0xff] %vm128_vm2, %v178_v61 }
 0x1b5   :  { %v193_v0 = vpack.c.bf16 %v191_v63, %v191_v63 }
 0x1b7   :  { %196 = vst.msk [vmem:[%s362_s5] sm:$0xf] %vm195_vm10, %v193_v0 }
 0x1ba   :  { %v186_v1 = vld [vmem:[#allocation3 + $0x8] sm:$0xff] }
 0x1bb   :  { %v192_v2 = vadd.f32 %v230_v59, %v186_v1 }
 0x1bd   :  { %v194_v3 = vpack.c.bf16 %v192_v2, %v192_v2 }
 0x1bf   :  { %197 = vst.msk [vmem:[%s362_s5 + $0x4] sm:$0xf] %vm195_vm10, %v194_v3 }
 0x1c0   :  { %202 = vsyncpa [#allocation5], 1 }
 0x1c1   :  { %203 = vsyncpa [#allocation7], 1 }

// kernel: block_forward.6
= control target key start
LH: loop header
LB: loop body
LE: loop exit
PB: predicated region body
PF: predicated region fallthrough
CT: control target
= control target key end

     0   :  { %s970_s0 = inlined_call_operand.vmem [shape: bf16[2,4,8,8], index: 0, kind: input, shape index: {}]   ;;  %s971_s1 = inlined_call_operand.vmem [shape: bf16[2,4,8,8], index: 1, kind: input, shape index: {}]   ;;  %s972_s2 = inlined_call_operand.vmem [shape: bf16[2,4,8,8], index: 2, kind: input, shape index: {}]   ;;  %s973_s3 = inlined_call_operand.vmem [shape: bf16[2,4,8,8], index: 3, kind: output, shape index: {0}]   ;;  %s974_s4 = inlined_call_operand.hbm [shape: bf16[2,4,8,8], index: 4, kind: output, shape index: {1}]  }
   0x1   :  { %975 = sst [smem:[#allocation5_spill]] %s970_s0 }
   0x2   :  { %10 = vsyncpa [#allocation3], 0 }
   0x3   :  { %12 = vsyncpa [#allocation3 + $0x1], 0  ;;  %s819_s15 = smov 0   ;;  %s821_s16 = smov 0  }
   0x4   :  { %s823_s17 = smov 0   ;;  %s825_s18 = smov 0  }
   0x5   :  { %s827_s19 = smov 0   ;;  %s829_s20 = smov 0  }
   0x6   :  { %s831_s21 = smov 0   ;;  %s833_s22 = smov 0  }
   0x7 LB: > { %s602_s23 = sadd.s32 4294967295, %s792_s22   ;;  %s603_s24 = sadd.s32 4294967294, %s792_s22   ;;  %s792_s22 = sphi %s833_s22, %s18_s22   ;;  %s788_s21 = sphi %s831_s21, %s985_s21   ;;  %s784_s20 = sphi %s829_s20, %s984_s20   ;;  %s780_s19 = sphi %s827_s19, %s983_s19   ;;  %s776_s18 = sphi %s825_s18, %s982_s18   ;;  %s772_s17 = sphi %s823_s17, %s981_s17   ;;  %s768_s16 = sphi %s821_s16, %s980_s16   ;;  %s764_s15 = sphi %s819_s15, %s979_s15  }
   0x8   : > { %s33_s25 = sadd.s32 1, %s784_s20  ;;  %s37_s26 = sadd.s32 1, %s788_s21 }
   0x9   : > { %p35_p0 = scmp.ge.s32.totalorder %s33_s25, 4  ;;  %p174_p1 = scmp.ne.s32.totalorder %s772_s17, %s768_s16 }
   0xa   : > { %p175_p2 = scmp.eq.s32.totalorder %s602_s23, 7  ;;  %p180_p5 = scmp.ne.s32.totalorder %s768_s16, %s764_s15 }
   0xb   : > { %s987_s25 = smov (%p35_p0, %s33_s25), 0  ;;  %s989_s26 = smov (!%p35_p0, %s37_s26), %s788_s21 }
   0xc   : > { %s158_s27 = ssub.s32 %s784_s20, %s987_s25  ;;  %p870_p3 = por %p175_p2, %p174_p1 }
   0xd   : > { %p39_p4 = scmp.ge.s32.totalorder %s989_s26, 2  ;;  %p181_p6 = scmp.eq.s32.totalorder %s603_s24, 7 }
   0xe   : > { %p606_p7 = scmp.ge.s32.totalorder %s792_s22, 1  ;;  %p235_p9 = scmp.lt.s32.totalorder %s792_s22, 9 }
   0xf   : > { %s991_s26 = smov (%p39_p4, %s989_s26), 0  ;;  %p879_p8 = por %p181_p6, %p180_p5 }
  0x10   : > { %s157_s30 = ssub.s32 %s788_s21, %s991_s26  ;;  %s164_s5 = sadd.s32 1, %s772_s17 }
  0x11   : > { %s159_s6 = sor.u32 %s158_s27, %s157_s30  ;;  %p236_p10 = pnand %p606_p7, %p235_p9 }
  0x12   : > { %p162_p11 = scmp.eq.s32.totalorder %s159_s6, 0  ;;  %p294_p12 = scmp.lt.s32.totalorder (!%p236_p10), %s780_s19, 1 }
  0x13   : > { %239 = sbr.rel (%p236_p10) target bundleno = 556 (0x22c), region = 32  ;;  %p296_p13 = scmp.lt.s32.totalorder (!%p236_p10), %s776_s18, 3 }
  0x14   : > { %s888_s7 = scalar_select %p162_p11, %s772_s17, %s164_s5  }
  0x15   : > { %s978_s0 = sld [smem:[#allocation5_spill]] (!%p236_p10)  ;;  %s291_s5 = sand.u32 (!%p236_p10), 1, %s768_s16  }
  0x16   : > { %s909_s6 = sshll.u32 (!%p236_p10), %s291_s5, 2  ;;  %s619_s13 = sshll.u32 (!%p236_p10), %s780_s19, 2 }
  0x17   : > { %s431_s14 = sadd.s32 (!%p236_p10), %s776_s18, %s619_s13  ;;  %s718_s13 = scalar_lea.hbm (!%p236_p10), %s974_s4, 32 }
  0x18   : > { %s295_s8 = scalar_select %p294_p12, %s780_s19, 1  ;;  %vm339_vm0 = vcmask 64512   ;;  %v360_v6 = vlaneseq  ;;  %vm369_vm2 = vcmask 60416   ;;  %vm386_vm3 = vcmask 1043456  }
  0x19   : > { %s297_s9 = scalar_select %p296_p13, %s776_s18, 3 }
  0x1a   : > { %s608_s10 = sshll.u32 %s295_s8, 2  ;;  %v361_v7 = vshrl.u32 %v360_v6, 7  ;;  %v365_v8 = vand.u32 127, %v360_v6  ;;  %s293_s8 = scalar_lea.vmem [#allocation2], %s909_s6 }
  0x1b   : > { %s302_s11 = sadd.s32 %s608_s10, %s297_s9  ;;  %s435_s6 = sshll.u32 %s293_s8, 4  ;;  %s436_s6 = int_to_ptr.vmem [resolvable:$true] %s435_s6 }
  0x1c   : > { %s894_s12 = sshll.u32 %s302_s11, 2  ;;  %vm366_vm1 = vcmp.le.s32.totalorder %v365_v8, %v361_v7  ;;  %s417_s10 = scalar_lea.sflag [#allocation3], %s291_s5 }
  0x1d   : > { %s312_s23 = scalar_lea.vmem %s971_s1, %s894_s12  ;;  %s304_s30 = scalar_lea.vmem %s978_s0, %s894_s12 }
  0x1e   : > { %v337_v0 = vld [vmem:[%s312_s23] sm:$0xf]  ;;  %s320_s11 = scalar_lea.vmem %s972_s2, %s894_s12  ;;  %s620_s23 = sshll.u32 %s431_s14, 2 }
  0x1f   : > { %v333_v1 = vld [vmem:[%s304_s30] sm:$0xf]  ;;  %v344_v2 = vsel %vm339_vm0, %v337_v0, 0  ;;  %s433_s30 = scalar_lea.hbm %s974_s4, %s620_s23 }
  0x20   : > { %v334_v3 = vunpack.c.l.bf16 %v333_v1  ;;  %353 = vmatpush.bf16.xpose.msra.mxu0 %v344_v2  ;;  %v338_v19 = vld [vmem:[%s320_s11] sm:$0xf]  ;;  %s437_s9 = sshll.u32 %s433_s30, 4  ;;  %s438_s9 = int_to_ptr.hbm [resolvable:$true] %s437_s9 }
  0x21   : > { %v388_v20 = vsel %vm386_vm3, %v338_v19, 0  ;;  %s712_s11 = sshra.s32 %s438_s9, 4  ;;  %s713_s11 = int_to_ptr.hbm [resolvable:$true] %s712_s11 }
  0x22   : > { %v335_v4 = vmul.f32 0.35355338, %v334_v3  ;;  %397 = vmatpush.bf16.msra.mxu1 %v388_v20  ;;  %s714_s0 = scalar_lea.hbm %s713_s11, 4  ;;  %p719_p4 = scmp.lt.s32.totalorder %s713_s11, %s974_s4 }
  0x23   : > { %p715_p0 = scmp.ne.s32.totalorder %s713_s11, %s714_s0  ;;  %p720_p5 = scmp.lt.s32.totalorder %s718_s13, %s714_s0 }
  0x24   : > { %v336_v5 = vpack.c.bf16 %v335_v4, %v335_v4 }
  0x25   : > { %p716_p1 = pnand %p715_p0, %p870_p3  ;;  %p721_p6 = por %p720_p5, %p719_p4 }
  0x27   : > { %616 = vmatmul.msk.bf16.vlgmr.msra.gmra.mxu0 %vm339_vm0, %v336_v5  ;;  %p717_p2 = pneg %p716_p1 }
  0x29   : > { %p722_p7 = pnand %p721_p6, %p717_p2 }
  0xa4   : > { %v355_v9 = vpop.f32.mrf.mxu0 }
  0xa5   : > { %v367_v10 = vsel %vm366_vm1, %v355_v9, -inf }
  0xa6   : > { %v368_v11 = vpack.c.bf16 %v367_v10, %v367_v10  ;;  %v371_v12 = vsel %vm339_vm0, %v367_v10, -inf }
  0xa7   : > { %372 = vmax.xlane.f32.xlu0 %v371_v12 }
  0xa8   : > { %370 = vst.msk [vmem:[%s293_s8] sm:$0xf] %vm369_vm2, %v368_v11 }
  0xac   : > { %v357_v13 = vpop.f32.mrf.mxu0 }
 0x11a   : > { %v373_v14 = vpop.xlane.xlu0 %372 }
 0x11b   : > { %v374_v15 = vsub.f32 %v367_v10, %v373_v14 }
 0x11d   : > { %v375_v16 = vmul.f32 1.442695, %v374_v15 }
 0x11f   : > { %694 = vpow2.f32 %v375_v16 }
 0x125   : > { %v695_v17 = vpop.eup %694 }
 0x126   : > { %v377_v18 = vsel %vm339_vm0, %v695_v17, 0.0 }
 0x127   : > { %378 = vadd.xlane.f32.xlu0 %v377_v18 }
 0x19a   : > { %v379_v21 = vpop.xlane.xlu0 %378 }
 0x19b   : > { %696 = vrcp.f32 %v379_v21 }
 0x1a1   : > { %v697_v22 = vpop.eup %696 }
 0x1a2   : > { %v381_v23 = vmul.f32 %v697_v22, %v695_v17 }
 0x1a4   : > { %v382_v24 = vpack.c.bf16 %v381_v23, %v381_v23 }
 0x1a6   : > { %617 = vmatmul.msk.bf16.vlgmr.msra.gmra.mxu1 %vm339_vm0, %v382_v24 }
 0x1a7   : > { %725 = shalt.err (!%p722_p7)
}
 0x1a8   : > { %623 = dma.vmem_to_hbm [thread:$0]  (%p870_p3), %s436_s6, 64, %s438_s9, %s417_s10  }
 0x1a9   : > { %s331_s23 = scalar_lea.vmem %s973_s3, %s894_s12 }
 0x223   : > { %v399_v25 = vpop.f32.mrf.mxu1 }
 0x224   : > { %v403_v26 = vpack.c.bf16 %v399_v25, %v399_v25 }
 0x226   : > { %404 = vst.msk [vmem:[%s331_s23] sm:$0xf] %vm369_vm2, %v403_v26 }
 0x22b   : > { %v401_v27 = vpop.f32.mrf.mxu1 }
 0x22c PF: > { %p629_p9 = scmp.ge.s32.totalorder %s792_s22, 2  ;;  %s463_s0 = sand.u32 1, %s764_s15  }
 0x22d   : > { %s464_s28 = scalar_lea.sflag [#allocation3], %s463_s0 }
 0x22e   : > { %p626_p10 = pnand %p629_p9, %p879_p8 }
 0x230   : > { %p627_p11 = pneg %p626_p10 }
 0x232   : > { %759 = dma.done.wait (%p627_p11), %s464_s28, 64  }
 0x233   : > { %761 = vsyncadd (%p627_p11), %s464_s28, 4294967232  ;;  %s18_s22 = sadd.s32 1, %s792_s22   ;;  %s979_s15 = smov %s768_s16 }
 0x234   : > { %p15_p3 = scmp.ge.s32.totalorder %s18_s22, 10   ;;  %s980_s16 = smov %s772_s17 }
 0x235   : > { %s981_s17 = smov %s888_s7  ;;  %s982_s18 = smov %s784_s20 }
 0x236   : > { %s983_s19 = smov %s788_s21  ;;  %s984_s20 = smov %s987_s25 }
 0x237   : > { %s985_s21 = smov %s991_s26  ;;  %17 = sbr.rel (!%p15_p3) target bundleno = 7 (0x7), region = 85 }
 0x23c   :  { %470 = vsyncpa [#allocation3], 1 }
 0x23d   :  { %472 = vsyncpa [#allocation3 + $0x1], 1 }

// kernel: block_forward.8
= control target key start
LH: loop header
LB: loop body
LE: loop exit
PB: predicated region body
PF: predicated region fallthrough
CT: control target
= control target key end

     0   :  { %vm27_vm0 = vcmask 261120   ;;  %v220_v4 = vmov 32.0   ;;  %vm93_vm6 = vcmask 257024   ;;  %s280_s0 = inlined_call_operand.vmem [shape: f32[16,32], index: 0, kind: input, shape index: {}]   ;;  %s281_s1 = inlined_call_operand.vmem [shape: f32[1,32], index: 1, kind: input, shape index: {}]   ;;  %s282_s2 = inlined_call_operand.vmem [shape: f32[1,32], index: 2, kind: input, shape index: {}]   ;;  %s283_s4 = inlined_call_operand.vmem [shape: f32[1,128], index: 4, kind: input, shape index: {}]   ;;  %s284_s3 = inlined_call_operand.vmem [shape: bf16[32,128], index: 3, kind: input, shape index: {}]   ;;  %s285_s5 = inlined_call_operand.vmem [shape: bf16[16,128], index: 5, kind: output, shape index: {}]  }
   0x1   :  { %v25_v0 = vld [vmem:[%s280_s0] sm:$0xff]  ;;  %v26_v2 = vld [vmem:[%s280_s0 + $0x8] sm:$0xff]  ;;  %210 = vrcp.f32 %v220_v4 }
   0x2   :  { %v28_v1 = vsel %vm27_vm0, %v25_v0, 0.0  ;;  %v31_v3 = vsel %vm27_vm0, %v26_v2, 0.0  ;;  %v200_v24 = vld [vmem:[%s284_s3 + $0x8] sm:$0xff]  ;;  %v199_v27 = vld [vmem:[%s284_s3] sm:$0xff] }
   0x3   :  { %29 = vadd.xlane.f32.xlu0 %v28_v1  ;;  %136 = vmatpush.bf16.msra.mxu0 %v200_v24  ;;  %v207_v37 = vld [vmem:[%s281_s1] ss:$0 sm:$0xff] }
   0x4   :  { %v208_v40 = vld [vmem:[%s282_s2] ss:$0 sm:$0xff] }
   0x5   :  { %v209_v54 = vld [vmem:[%s283_s4] ss:$0 sm:$0xff] }
   0x7   :  { %v211_v5 = vpop.eup %210  ;;  %137 = vmatpush.bf16.msra.mxu0 %v199_v27 }
   0x8   :  { %v35_v6 = vmul.f32 32.0, %v211_v5  ;;  %vm39_vm1 = vweird.f32 %v211_v5 }
   0xa   :  { %v36_v7 = vsub.f32 1.0, %v35_v6 }
   0xb   :  { %32 = vadd.xlane.f32.xlu0 %v31_v3 }
   0xc   :  { %v37_v8 = vmul.f32 %v211_v5, %v36_v7 }
   0xe   :  { %v38_v9 = vadd.f32 %v211_v5, %v37_v8 }
  0x10   :  { %v40_v10 = vsel %vm39_vm1, %v211_v5, %v38_v9 }
  0x76   :  { %v30_v11 = vpop.xlane.xlu0 %29 }
  0x77   :  { %v41_v12 = vmul.f32 %v40_v10, %v30_v11 }
  0x79   :  { %v43_v13 = vsub.f32 %v25_v0, %v41_v12 }
  0x7b   :  { %v45_v14 = vmul.f32 %v43_v13, %v43_v13 }
  0x7d   :  { %v47_v15 = vsel %vm27_vm0, %v45_v14, 0.0 }
  0x7e   :  { %48 = vadd.xlane.f32.xlu1 %v47_v15  ;;  %v33_v16 = vpop.xlane.xlu0 %32 }
  0x7f   :  { %v42_v17 = vmul.f32 %v40_v10, %v33_v16 }
  0x81   :  { %v44_v18 = vsub.f32 %v26_v2, %v42_v17 }
  0x83   :  { %v46_v19 = vmul.f32 %v44_v18, %v44_v18 }
  0x85   :  { %v50_v20 = vsel %vm27_vm0, %v46_v19, 0.0 }
  0x86   :  { %51 = vadd.xlane.f32.xlu1 %v50_v20 }
  0xf1   :  { %v49_v21 = vpop.xlane.xlu1 %48 }
  0xf2   :  { %v53_v22 = vmul.f32 %v49_v21, %v40_v10 }
  0xf4   :  { %v55_v23 = vadd.f32 1e-05, %v53_v22 }
  0xf6   :  { %212 = vrsqrt.f32 %v55_v23  ;;  %vm63_vm3 = vweird.f32 %v55_v23 }
  0xf9   :  { %v52_v25 = vpop.xlane.xlu1 %51 }
  0xfa   :  { %v54_v26 = vmul.f32 %v52_v25, %v40_v10 }
  0xfc   :  { %v213_v28 = vpop.eup %212  ;;  %v56_v29 = vadd.f32 1e-05, %v54_v26 }
  0xfd   :  { %v58_v30 = vmul.f32 %v213_v28, %v55_v23  ;;  %vm64_vm2 = vweird.f32 %v213_v28 }
  0xfe   :  { %214 = vrsqrt.f32 %v56_v29  ;;  %vm65_vm4 = vmor %vm63_vm3, %vm64_vm2  ;;  %vm73_vm7 = vweird.f32 %v56_v29 }
  0xff   :  { %v59_v31 = vmul.f32 %v213_v28, %v58_v30 }
 0x101   :  { %v60_v32 = vmul.f32 0.5, %v59_v31 }
 0x103   :  { %v61_v33 = vsub.f32 1.5, %v60_v32 }
 0x104   :  { %v215_v34 = vpop.eup %214 }
 0x105   :  { %v62_v35 = vmul.f32 %v213_v28, %v61_v33  ;;  %v68_v36 = vmul.f32 %v215_v34, %v56_v29  ;;  %vm74_vm5 = vweird.f32 %v215_v34 }
 0x106   :  { %vm75_vm8 = vmor %vm73_vm7, %vm74_vm5 }
 0x107   :  { %v66_v38 = vsel %vm65_vm4, %v213_v28, %v62_v35  ;;  %v69_v39 = vmul.f32 %v215_v34, %v68_v36 }
 0x108   :  { %v77_v41 = vmul.f32 %v66_v38, %v43_v13 }
 0x109   :  { %v70_v42 = vmul.f32 0.5, %v69_v39 }
 0x10a   :  { %v83_v43 = vmul.f32 %v207_v37, %v77_v41 }
 0x10b   :  { %v71_v44 = vsub.f32 1.5, %v70_v42 }
 0x10c   :  { %v89_v45 = vadd.f32 %v208_v40, %v83_v43 }
 0x10d   :  { %v72_v46 = vmul.f32 %v215_v34, %v71_v44 }
 0x10e   :  { %v91_v47 = vpack.c.bf16 %v89_v45, %v89_v45 }
 0x10f   :  { %v76_v48 = vsel %vm75_vm8, %v215_v34, %v72_v46 }
 0x110   :  { %94 = vst.msk [vmem:[#allocation2] sm:$0xf] %vm93_vm6, %v91_v47  ;;  %v78_v49 = vmul.f32 %v76_v48, %v44_v18 }
 0x112   :  { %v84_v50 = vmul.f32 %v207_v37, %v78_v49 }
 0x114   :  { %v90_v51 = vadd.f32 %v208_v40, %v84_v50 }
 0x116   :  { %v92_v52 = vpack.c.bf16 %v90_v51, %v90_v51 }
 0x118   :  { %95 = vst.msk [vmem:[#allocation2 + $0x4] sm:$0xf] %vm93_vm6, %v92_v52 }
 0x11f   :  { %v198_v53 = vld [vmem:[#allocation2] sm:$0xff] }
 0x120   :  { %197 = vmatmul.msk.bf16.vlgmr.msra.gmra.mxu0 %vm27_vm0, %v198_v53 }
 0x19d   :  { %v139_v55 = vpop.f32.mrf.mxu0 }
 0x19e   :  { %v157_v56 = vadd.f32 %v209_v54, %v139_v55 }
 0x1a0   :  { %v161_v57 = vmul.f32 0.044715, %v157_v56  ;;  %v159_v8 = vmul.f32 0.5, %v157_v56 }
 0x1a2   :  { %v163_v58 = vmul.f32 %v161_v57, %v157_v56 }
 0x1a4   :  { %v165_v59 = vmul.f32 %v163_v58, %v157_v56 }
 0x1a5   :  { %v141_v60 = vpop.f32.mrf.mxu0 }
 0x1a6   :  { %v167_v61 = vadd.f32 %v165_v59, %v157_v56  ;;  %v158_v62 = vadd.f32 %v209_v54, %v141_v60 }
 0x1a8   :  { %v162_v63 = vmul.f32 0.044715, %v158_v62  ;;  %v169_v0 = vmul.f32 0.7978846, %v167_v61  ;;  %v160_v9 = vmul.f32 0.5, %v158_v62 }
 0x1aa   :  { %v164_v1 = vmul.f32 %v162_v63, %v158_v62  ;;  %216 = vtanh.f32 %v169_v0 }
 0x1ac   :  { %v166_v2 = vmul.f32 %v164_v1, %v158_v62 }
 0x1ae   :  { %v168_v3 = vadd.f32 %v166_v2, %v158_v62 }
 0x1b0   :  { %v170_v4 = vmul.f32 0.7978846, %v168_v3  ;;  %v217_v5 = vpop.eup %216 }
 0x1b1   :  { %v173_v6 = vadd.f32 1.0, %v217_v5 }
 0x1b2   :  { %218 = vtanh.f32 %v170_v4 }
 0x1b3   :  { %v175_v11 = vmul.f32 %v173_v6, %v159_v8 }
 0x1b8   :  { %v219_v7 = vpop.eup %218 }
 0x1b9   :  { %v174_v10 = vadd.f32 1.0, %v219_v7 }
 0x1bb   :  { %v176_v12 = vmul.f32 %v174_v10, %v160_v9 }
 0x1bd   :  { %v204_v13 = vpack.c.bf16 %v176_v12, %v175_v11 }
 0x1bf   :  { %205 = vst [vmem:[%s285_s5] sm:$0xff] %v204_v13  }

// kernel: block_forward.9
= control target key start
LH: loop header
LB: loop body
LE: loop exit
PB: predicated region body
PF: predicated region fallthrough
CT: control target
= control target key end

     0   :  { %vm22_vm0 = vcmask 261120   ;;  %v229_v2 = vmov 0.0   ;;  %s303_s0 = inlined_call_operand.vmem [shape: bf16[16,128], index: 0, kind: input, shape index: {}]   ;;  %s304_s1 = inlined_call_operand.vmem [shape: bf16[128,32], index: 1, kind: input, shape index: {}]   ;;  %s305_s2 = inlined_call_operand.vmem [shape: f32[1,32], index: 2, kind: input, shape index: {}]   ;;  %s306_s3 = inlined_call_operand.vmem [shape: f32[16,32], index: 3, kind: input, shape index: {}]   ;;  %s307_s4 = inlined_call_operand.hbm [shape: f32[16,32], index: 4, kind: output, shape index: {}]  }
   0x1   :  { %v197_v0 = vld [vmem:[%s304_s1 + $0x38] sm:$0xff]  ;;  %v196_v1 = vld [vmem:[%s304_s1 + $0x30] sm:$0xff]  ;;  %23 = vst.msk [vmem:[#allocation2] sm:$0xff] %vm22_vm0, %v229_v2 }
   0x2   :  { %99 = vmatpush.bf16.msra.mxu0 %v197_v0  ;;  %24 = vst.msk [vmem:[#allocation2 + $0x8] sm:$0xff] %vm22_vm0, %v229_v2 }
   0x3   :  { %9 = vsyncpa [#allocation4], 0  ;;  %v195_v3 = vld [vmem:[%s304_s1 + $0x28] sm:$0xff]  ;;  %v194_v4 = vld [vmem:[%s304_s1 + $0x20] sm:$0xff]  ;;  %s141_s13 = sshll.u32 %s307_s4, 4  ;;  %s231_s15 = smov 128   ;;  %s142_s13 = int_to_ptr.hbm [resolvable:$true] %s141_s13 }
   0x4   :  { %v193_v5 = vld [vmem:[%s304_s1 + $0x18] sm:$0xff]  ;;  %v192_v6 = vld [vmem:[%s304_s1 + $0x10] sm:$0xff]  ;;  %v191_v7 = vld [vmem:[%s304_s1 + $0x8] sm:$0xff]  ;;  %s232_s16 = smov 8  }
   0x5   :  { %v190_v8 = vld [vmem:[%s304_s1] sm:$0xff]  ;;  %v130_v22 = vld [vmem:[%s306_s3 + $0x8] sm:$0xff] }
   0x6   :  { %100 = vmatpush.bf16.msra.mxu0 %v196_v1  ;;  %v189_v9 = vld [vmem:[%s303_s0] sm:$0xff]  ;;  %s230_s0 = smov [#allocation3]  }
   0x7   :  { %v202_v14 = vld [vmem:[%s305_s2] ss:$0 sm:$0xff]  ;;  %s139_s10 = sshll.u32 %s230_s0, 4  ;;  %s140_s10 = int_to_ptr.vmem [resolvable:$true] %s139_s10 }
   0x8   :  { %v25_v10 = vld [vmem:[#allocation2] sm:$0xff] }
   0x9   :  { %v26_v13 = vld [vmem:[#allocation2 + $0x8] sm:$0xff]  ;;  %v129_v18 = vld [vmem:[%s306_s3] sm:$0xff] }
   0xa   :  { %101 = vmatpush.bf16.msra.mxu0 %v195_v3 }
   0xe   :  { %102 = vmatpush.bf16.msra.mxu0 %v194_v4 }
  0x12   :  { %103 = vmatpush.bf16.msra.mxu0 %v193_v5 }
  0x16   :  { %104 = vmatpush.bf16.msra.mxu0 %v192_v6 }
  0x1a   :  { %105 = vmatpush.bf16.msra.mxu0 %v191_v7 }
  0x1e   :  { %106 = vmatpush.bf16.msra.mxu0 %v190_v8 }
  0x21   :  { %107 = vmatmul.bf16.vlgmr.msra.gmra.mxu0 %v189_v9 }
  0x9e   :  { %v108_v11 = vpop.f32.mrf.mxu0 }
  0x9f   :  { %v113_v12 = vadd.f32 %v108_v11, %v25_v10 }
  0xa1   :  { %116 = vst.msk [vmem:[#allocation2] sm:$0xff] %vm22_vm0, %v113_v12 }
  0xa6   :  { %v110_v15 = vpop.f32.mrf.mxu0 }
  0xa7   :  { %v114_v16 = vadd.f32 %v110_v15, %v26_v13 }
  0xa8   :  { %v121_v17 = vld [vmem:[#allocation2] sm:$0xff] }
  0xa9   :  { %117 = vst.msk [vmem:[#allocation2 + $0x8] sm:$0xff] %vm22_vm0, %v114_v16  ;;  %v127_v19 = vadd.f32 %v202_v14, %v121_v17 }
  0xab   :  { %v131_v20 = vadd.f32 %v129_v18, %v127_v19 }
  0xad   :  { %133 = vst.msk [vmem:[#allocation3] sm:$0xff] %vm22_vm0, %v131_v20 }
  0xb0   :  { %v122_v21 = vld [vmem:[#allocation2 + $0x8] sm:$0xff] }
  0xb1   :  { %v128_v23 = vadd.f32 %v202_v14, %v122_v21 }
  0xb3   :  { %v132_v24 = vadd.f32 %v130_v22, %v128_v23 }
  0xb5   :  { %134 = vst.msk [vmem:[#allocation3 + $0x8] sm:$0xff] %vm22_vm0, %v132_v24 }
  0xb6   :  { %147 = dma.vmem_to_hbm [thread:$0]  %s140_s10, 256, %s142_s13, [#allocation4], %s231_s15, %s231_s15, %s232_s16  }
  0xb7   :  { %227 = dma.done.wait [#allocation4], 256  }
  0xb8   :  { %228 = vsyncadd [#allocation4], 4294967040 }
  0xb9   :  { %152 = vsyncpa [#allocation4], 1 }

</bundles_post_ra>
